<compile_context>
chip_gen: v5e
topology: v5e:2x2
jax: 0.10.0
libtpu: 0.0.40
codegen_flags: <defaults>
</compile_context>

<pallas_src>
import functools
import math

import jax
import jax.numpy as jnp
from jax import lax
from jax.experimental import pallas as pl
from jax.experimental.pallas import tpu as pltpu

# ---------------- synthetic "cfg" ----------------
IN_CH = 3
IMG_H = IMG_W = 32
CONV_DIMS = (16, 32)          # Conv_Body channels (two stride-2 convs)
FEAT_STRIDE = 4               # spatial_scale = 1/4
NUM_ANCHORS = 3
ANCHOR_SIZES = (8.0, 16.0, 32.0)
TOPK_PROPOSALS = 8            # per image
ROI_RESOLUTION = 7
HIDDEN = 128                  # lane-dense hidden dim for the 2-MLP head
NUM_CLASSES = 5
BBOX_XFORM_CLIP = math.log(1000.0 / 16.0)

TM_MAX = 256                  # row-tile upper bound; shrinks to fit small M
HEAD_BLOCK = 128              # lane-dense head column block width
NEG_INF_BIAS = -1e30          # bias on padded cls columns -> exp underflows to 0 in the fused softmax


def _round_up(v, m):
    return ((v + m - 1) // m) * m


# ---------------- Pallas kernel 1: fused RPN cls+bbox 1x1 heads ----------------
def _rpn_head_kernel(x_ref, w_ref, b_ref, o_ref):
    """out = x @ w + b, sigmoid on the cls block [0,128), identity on the bbox
    block [128,256).  In-kernel bf16 cast; f32 accumulation; lane-aligned stores."""
    x = x_ref[...].astype(jnp.bfloat16)          # cast rides the idle VPU under the MXU
    out = jnp.dot(x, w_ref[...], preferred_element_type=jnp.float32) + b_ref[...]
    o_ref[:, :HEAD_BLOCK] = jax.nn.sigmoid(out[:, :HEAD_BLOCK]).astype(o_ref.dtype)
    o_ref[:, HEAD_BLOCK:] = out[:, HEAD_BLOCK:].astype(o_ref.dtype)


def rpn_head(x, w, b):
    """x:(M,K) f32, w:(K,256) bf16, b:(256,) f32 -> (M,256) f32 (padded, lane-dense)."""
    M, K = x.shape
    N = w.shape[1]
    tm = min(TM_MAX, _round_up(M, 16))           # multiple of 16: bf16 sublane packing (v5e)
    grid = (pl.cdiv(M, tm),)
    return pl.pallas_call(
        _rpn_head_kernel,
        out_shape=jax.ShapeDtypeStruct((M, N), jnp.float32),
        grid=grid,
        in_specs=[
            pl.BlockSpec((tm, K), lambda i: (i, 0)),
            pl.BlockSpec((K, N), lambda i: (0, 0)),
            pl.BlockSpec((1, N), lambda i: (0, 0)),
        ],
        out_specs=pl.BlockSpec((tm, N), lambda i: (i, 0)),
        compiler_params=pltpu.CompilerParams(
            dimension_semantics=("parallel",),   # M axis -> megacore on v7x
            vmem_limit_bytes=32 * 1024 * 1024,
        ),
    )(x, w, b.reshape(1, N).astype(jnp.float32))


# ---------------- Pallas kernel 2: fused box head (fc1->fc2->outputs) ----------------
def _box_head_kernel(x_ref, w1_ref, b1_ref, w2_ref, b2_ref, w3_ref, b3_ref, o_ref):
    """One fused kernel: relu(x@w1+b1) -> relu(.@w2+b2) -> .@w3+b3, then a
    row-softmax over the cls block [0,128) (padded cls cols carry a -1e30 bias
    so their exp() contribution is 0).  Intermediates stay in VMEM/vregs."""
    x = x_ref[...].astype(jnp.bfloat16)
    h = jnp.dot(x, w1_ref[...], preferred_element_type=jnp.float32) + b1_ref[...]
    h = jnp.maximum(h, 0.0)
    h = jnp.dot(h.astype(jnp.bfloat16), w2_ref[...], preferred_element_type=jnp.float32) + b2_ref[...]
    h = jnp.maximum(h, 0.0)
    out = jnp.dot(h.astype(jnp.bfloat16), w3_ref[...], preferred_element_type=jnp.float32) + b3_ref[...]
    cls = out[:, :HEAD_BLOCK]
    m = jnp.max(cls, axis=-1, keepdims=True)
    e = jnp.exp(cls - m)
    s = jnp.sum(e, axis=-1, keepdims=True)
    inv_s = pl.reciprocal(s, approx=True)        # EUP slot; frees a VALU divide
    o_ref[:, :HEAD_BLOCK] = (e * inv_s).astype(o_ref.dtype)
    o_ref[:, HEAD_BLOCK:] = out[:, HEAD_BLOCK:].astype(o_ref.dtype)


def box_head_fused(x, params):
    """x:(R,roi_feat) f32 -> (R,256) f32: [cls_prob | pad | bbox_pred | pad]."""
    M, K = x.shape
    H = HIDDEN
    N = params["head_w"].shape[1]
    tm = min(TM_MAX, _round_up(M, 16))
    grid = (pl.cdiv(M, tm),)
    # TODO(synk): at realistic sizes (roi_feat ~ 12.5K, HIDDEN >= 1024) add a K
    # grid axis + f32 accumulator scratch for fc1 so the blocks fit v7x's VMEM.
    return pl.pallas_call(
        _box_head_kernel,
        out_shape=jax.ShapeDtypeStruct((M, N), jnp.float32),
        grid=grid,
        in_specs=[
            pl.BlockSpec((tm, K), lambda i: (i, 0)),
            pl.BlockSpec((K, H), lambda i: (0, 0)),
            pl.BlockSpec((1, H), lambda i: (0, 0)),
            pl.BlockSpec((H, H), lambda i: (0, 0)),
            pl.BlockSpec((1, H), lambda i: (0, 0)),
            pl.BlockSpec((H, N), lambda i: (0, 0)),
            pl.BlockSpec((1, N), lambda i: (0, 0)),
        ],
        out_specs=pl.BlockSpec((tm, N), lambda i: (i, 0)),
        compiler_params=pltpu.CompilerParams(
            dimension_semantics=("parallel",),
            vmem_limit_bytes=32 * 1024 * 1024,
        ),
    )(x,
      params["fc1_w"], params["fc1_b"].reshape(1, H).astype(jnp.float32),
      params["fc2_w"], params["fc2_b"].reshape(1, H).astype(jnp.float32),
      params["head_w"], params["head_b"].reshape(1, N).astype(jnp.float32))


# ---------------- JAX glue: convs, proposals, RoIAlign ----------------
def conv2d(x_nhwc, w_hwio, b, stride):
    """3x3 pad=1 conv + bias + ReLU in NHWC.  Spatial convs stay on XLA's
    MXU-mapped conv (avoids materializing a 9x im2col tensor in HBM)."""
    y = lax.conv_general_dilated(
        x_nhwc.astype(jnp.bfloat16), w_hwio,
        window_strides=(stride, stride), padding=((1, 1), (1, 1)),
        dimension_numbers=("NHWC", "HWIO", "NHWC"),
        preferred_element_type=jnp.float32)
    return jnp.maximum(y + b[None, None, None, :], 0.0)


def generate_proposals(scores, deltas, nb, hf, wf, im_info):
    """Anchor decode + per-image top-k by objectness.
    # TODO(synk): RPN NMS has no clean Pallas equivalent; proposals are plain top-k.
    """
    A = NUM_ANCHORS
    scores = scores.reshape(nb, hf * wf * A)
    deltas = deltas.reshape(nb, hf * wf, A, 4).reshape(nb, hf * wf * A, 4)

    ys = (jnp.arange(hf, dtype=jnp.float32) + 0.5) * FEAT_STRIDE
    xs = (jnp.arange(wf, dtype=jnp.float32) + 0.5) * FEAT_STRIDE
    cy, cx = jnp.meshgrid(ys, xs, indexing="ij")
    cy = cy.reshape(-1, 1)
    cx = cx.reshape(-1, 1)
    sz = jnp.asarray(ANCHOR_SIZES, jnp.float32).reshape(1, A)
    anchors = jnp.stack([cx - sz / 2, cy - sz / 2, cx + sz / 2, cy + sz / 2],
                        axis=-1).reshape(hf * wf * A, 4)
    aw = anchors[:, 2] - anchors[:, 0]
    ah = anchors[:, 3] - anchors[:, 1]
    acx = anchors[:, 0] + 0.5 * aw
    acy = anchors[:, 1] + 0.5 * ah

    dx, dy = deltas[..., 0], deltas[..., 1]
    dw = jnp.minimum(deltas[..., 2], BBOX_XFORM_CLIP)   # Detectron-style clamp
    dh = jnp.minimum(deltas[..., 3], BBOX_XFORM_CLIP)
    pcx = acx[None] + dx * aw[None]
    pcy = acy[None] + dy * ah[None]
    pw = aw[None] * jnp.exp(dw)
    ph = ah[None] * jnp.exp(dh)
    bx1 = pcx - 0.5 * pw
    by1 = pcy - 0.5 * ph
    bx2 = pcx + 0.5 * pw
    by2 = pcy + 0.5 * ph

    imh = im_info[:, 0:1]
    imw = im_info[:, 1:2]
    bx1 = jnp.clip(bx1, 0.0, imw - 1.0)
    bx2 = jnp.clip(bx2, 0.0, imw - 1.0)
    by1 = jnp.clip(by1, 0.0, imh - 1.0)
    by2 = jnp.clip(by2, 0.0, imh - 1.0)
    boxes = jnp.stack([bx1, by1, bx2, by2], axis=-1)     # (nb, HWA, 4)

    _, top_idx = lax.top_k(scores, TOPK_PROPOSALS)
    top_boxes = jnp.take_along_axis(boxes, top_idx[..., None], axis=1)
    batch_idx = jnp.broadcast_to(
        jnp.arange(nb, dtype=jnp.float32)[:, None, None],
        (nb, TOPK_PROPOSALS, 1))
    rois = jnp.concatenate([batch_idx, top_boxes], axis=-1)
    return rois.reshape(nb * TOPK_PROPOSALS, 5)          # (R, 5)


def roi_align(feat_nhwc, rois, resolution, spatial_scale):
    """Bilinear RoIAlign expressed as interpolation-matrix matmuls (no per-element
    fancy-index gathers): pooled = Wy @ feat[b] @ Wx^T per RoI.
    # TODO(synk): RoIPoolF (max-pool + argmax) approximated by bilinear RoIAlign.
    """
    N, H, W, C = feat_nhwc.shape
    res = resolution
    b = rois[:, 0].astype(jnp.int32)
    x1 = rois[:, 1] * spatial_scale
    y1 = rois[:, 2] * spatial_scale
    x2 = rois[:, 3] * spatial_scale
    y2 = rois[:, 4] * spatial_scale
    rw = jnp.maximum(x2 - x1, 1.0)
    rh = jnp.maximum(y2 - y1, 1.0)
    bins = (jnp.arange(res, dtype=jnp.float32) + 0.5) / res
    ys = y1[:, None] + bins[None, :] * rh[:, None]       # (R, res)
    xs = x1[:, None] + bins[None, :] * rw[:, None]       # (R, res)

    def interp_weights(coords, size):
        c = jnp.clip(coords, 0.0, size - 1.0)
        c0 = jnp.floor(c)
        frac = c - c0
        c1 = jnp.minimum(c0 + 1.0, size - 1.0)
        grid = jnp.arange(size, dtype=jnp.float32)[None, None, :]
        w_lo = jnp.where(grid == c0[..., None], 1.0 - frac[..., None], 0.0)
        w_hi = jnp.where(grid == c1[..., None], frac[..., None], 0.0)
        return w_lo + w_hi                               # (R, res, size)

    wy = interp_weights(ys, H)                           # (R, res, H)
    wx = interp_weights(xs, W)                           # (R, res, W)
    onehot_b = (b[:, None] == jnp.arange(N)[None, :]).astype(feat_nhwc.dtype)  # (R, N)
    feat_r = jnp.einsum("rn,nhwc->rhwc", onehot_b, feat_nhwc)
    tmp = jnp.einsum("rih,rhwc->riwc", wy, feat_r)
    pooled = jnp.einsum("rjw,riwc->rijc", wx, tmp)       # (R, res, res, C)
    return pooled


# ---------------- parameters (deterministic, synthetic) ----------------
def init_params(key):
    ks = jax.random.split(key, 12)
    w = lambda k, s, sc=0.05: jax.random.normal(k, s, jnp.float32) * sc
    c1, c2 = CONV_DIMS
    res = ROI_RESOLUTION
    roi_feat = c2 * res * res

    def oihw_to_hwio(w_oihw):          # one-time relayout + bf16 cast (folded at init)
        return jnp.transpose(w_oihw, (2, 3, 1, 0)).astype(jnp.bfloat16)

    def pad_cols(mat, width):          # zero-pad columns to a lane-dense block width
        return jnp.pad(mat, ((0, 0), (0, width - mat.shape[1])))

    # fc1 generated in PyTorch (C,H,W)-flatten row order, then rows permuted once
    # to the NHWC flatten order so the forward needs no pooled-feature transpose.
    fc1_chw = w(ks[5], (roi_feat, HIDDEN))
    fc1_hwc = (fc1_chw.reshape(c2, res, res, HIDDEN)
               .transpose(1, 2, 0, 3).reshape(res * res * c2, HIDDEN))

    # Fused, lane-dense heads: cls group in cols [0,128), bbox group in [128,256),
    # zero-padded.  One Pallas launch each; unmasked full-vreg stores.
    rpn_cls_w = pad_cols(w(ks[3], (c2, NUM_ANCHORS)), HEAD_BLOCK)
    rpn_bbox_w = pad_cols(w(ks[4], (c2, 4 * NUM_ANCHORS)), HEAD_BLOCK)
    cls_w = pad_cols(w(ks[7], (HIDDEN, NUM_CLASSES)), HEAD_BLOCK)
    bbox_w = pad_cols(w(ks[8], (HIDDEN, 4 * NUM_CLASSES)), HEAD_BLOCK)

    # Padded cls columns get a -1e30 bias so the fused in-kernel softmax
    # assigns them exp() == 0 (no iota/where masking needed in the kernel).
    head_cls_b = jnp.where(jnp.arange(HEAD_BLOCK) < NUM_CLASSES, 0.0, NEG_INF_BIAS)
    head_b = jnp.concatenate(
        [head_cls_b, jnp.zeros((HEAD_BLOCK,))]).astype(jnp.float32)

    return {
        "conv1_w": oihw_to_hwio(w(ks[0], (c1, IN_CH, 3, 3))),
        "conv1_b": jnp.zeros((c1,), jnp.float32),
        "conv2_w": oihw_to_hwio(w(ks[1], (c2, c1, 3, 3))),
        "conv2_b": jnp.zeros((c2,), jnp.float32),
        "rpn_conv_w": oihw_to_hwio(w(ks[2], (c2, c2, 3, 3))),
        "rpn_conv_b": jnp.zeros((c2,), jnp.float32),
        "rpn_head_w": jnp.concatenate([rpn_cls_w, rpn_bbox_w], axis=1).astype(jnp.bfloat16),
        "rpn_head_b": jnp.zeros((2 * HEAD_BLOCK,), jnp.float32),
        "fc1_w": fc1_hwc.astype(jnp.bfloat16),
        "fc1_b": jnp.zeros((HIDDEN,), jnp.float32),
        "fc2_w": w(ks[6], (HIDDEN, HIDDEN)).astype(jnp.bfloat16),
        "fc2_b": jnp.zeros((HIDDEN,), jnp.float32),
        "head_w": jnp.concatenate([cls_w, bbox_w], axis=1).astype(jnp.bfloat16),
        "head_b": head_b,
    }


# ---------------- Generalized_RCNN forward (inference) ----------------
def generalized_rcnn_forward(params, im_data_nchw, im_info):
    # NCHW (PyTorch) -> NHWC (TPU-friendly layout), once.
    x = jnp.transpose(im_data_nchw, (0, 2, 3, 1))

    # Conv_Body
    h = conv2d(x, params["conv1_w"], params["conv1_b"], stride=2)
    blob_conv = conv2d(h, params["conv2_w"], params["conv2_b"], stride=2)

    # RPN: 3x3 conv + ReLU, then fused cls+bbox 1x1 heads as ONE lane-dense
    # Pallas matmul (sigmoid on the cls block inside the kernel).  The 1x1
    # heads cannot be folded into the 3x3 conv because of the intervening ReLU.
    rpn_feat = conv2d(blob_conv, params["rpn_conv_w"], params["rpn_conv_b"], stride=1)
    nb, hf, wf, cf = rpn_feat.shape
    flat = rpn_feat.reshape(nb * hf * wf, cf)
    rpn_out = rpn_head(flat, params["rpn_head_w"], params["rpn_head_b"])
    rpn_cls_prob = rpn_out[:, :NUM_ANCHORS]                                # slice lane padding off
    rpn_bbox_pred = rpn_out[:, HEAD_BLOCK:HEAD_BLOCK + 4 * NUM_ANCHORS]
    rois = generate_proposals(rpn_cls_prob, rpn_bbox_pred, nb, hf, wf, im_info)

    # Box_Head + Box_Outs: RoI transform, then fc1->relu->fc2->relu->head->softmax
    # fused in ONE Pallas kernel (intermediates never leave VMEM).
    pooled = roi_align(blob_conv, rois, ROI_RESOLUTION, 1.0 / FEAT_STRIDE)  # (R,res,res,C)
    box_in = pooled.reshape(pooled.shape[0], -1)
    head_out = box_head_fused(box_in, params)
    cls_score = head_out[:, :NUM_CLASSES]                                  # softmax probs (inference)
    bbox_pred = head_out[:, HEAD_BLOCK:HEAD_BLOCK + 4 * NUM_CLASSES]

    return {
        "blob_conv": jnp.transpose(blob_conv, (0, 3, 1, 2)),  # back to NCHW like PyTorch
        "rois": rois,
        "cls_score": cls_score,
        "bbox_pred": bbox_pred,
    }


if __name__ == "__main__":
    key = jax.random.PRNGKey(0)
    pkey, dkey = jax.random.split(key)
    params = init_params(pkey)

    data = jax.random.normal(dkey, (2, IN_CH, IMG_H, IMG_W), jnp.float32)
    im_info = jnp.array([[IMG_H, IMG_W, 1.0], [IMG_H, IMG_W, 1.0]], jnp.float32)

    fwd = jax.jit(generalized_rcnn_forward)
    out = fwd(params, data, im_info)
    jax.block_until_ready(out)

    R = 2 * TOPK_PROPOSALS
    assert out["blob_conv"].shape == (2, CONV_DIMS[1], IMG_H // FEAT_STRIDE, IMG_W // FEAT_STRIDE)
    assert out["rois"].shape == (R, 5)
    assert out["cls_score"].shape == (R, NUM_CLASSES)
    assert out["bbox_pred"].shape == (R, 4 * NUM_CLASSES)
    assert bool(jnp.all(jnp.isfinite(out["cls_score"])))
    assert bool(jnp.all(jnp.abs(jnp.sum(out["cls_score"], axis=-1) - 1.0) < 1e-2))
    print("KERNEL_OK")
</pallas_src>

<mosaic_0001>
module attributes {stable_mosaic.version = 11 : i64} {
  func.func @_rpn_head_kernel(%arg0: i32, %arg1: memref<128x32xf32, #tpu.memory_space<vmem>>, %arg2: memref<32x256xbf16, #tpu.memory_space<vmem>>, %arg3: memref<1x256xf32, #tpu.memory_space<vmem>>, %arg4: memref<128x256xf32, #tpu.memory_space<vmem>>) attributes {dimension_semantics = [#tpu.dimension_semantics<parallel>], iteration_bounds = array<i64: 1>, scalar_prefetch = 0 : i64, scratch_operands = 0 : i64, tpu.core_type = #tpu.core_type<tc>, window_params = [{transform_indices = @transform_0, window_bounds = array<i64: 128, 32>}, {pipeline_mode = #tpu.pipeline_mode<synchronous>, transform_indices = @transform_1, window_bounds = array<i64: 32, 256>}, {pipeline_mode = #tpu.pipeline_mode<synchronous>, transform_indices = @transform_2, window_bounds = array<i64: 1, 256>}, {transform_indices = @transform_3, window_bounds = array<i64: 128, 256>}]} {
    %c0 = arith.constant 0 : index
    %c0_0 = arith.constant 0 : index
    %0 = vector.load %arg1[%c0, %c0_0] : memref<128x32xf32, #tpu.memory_space<vmem>>, vector<128x32xf32>
    %1 = arith.truncf %0 : vector<128x32xf32> to vector<128x32xbf16>
    %c0_1 = arith.constant 0 : index
    %c0_2 = arith.constant 0 : index
    %2 = vector.load %arg2[%c0_1, %c0_2] : memref<32x256xbf16, #tpu.memory_space<vmem>>, vector<32x256xbf16>
    %cst = arith.constant dense<0.000000e+00> : vector<128x256xf32>
    %3 = tpu.matmul %1, %2, %cst {dimension_numbers = #tpu.dot_dimension_numbers<[1], [0], [0], [1], [0, 0, 1, 1], [], []>} : vector<128x32xbf16>, vector<32x256xbf16>, vector<128x256xf32> -> vector<128x256xf32>
    %c0_3 = arith.constant 0 : index
    %c0_4 = arith.constant 0 : index
    %4 = vector.load %arg3[%c0_3, %c0_4] : memref<1x256xf32, #tpu.memory_space<vmem>>, vector<1x256xf32>
    %5 = vector.broadcast %4 : vector<1x256xf32> to vector<128x256xf32>
    %6 = arith.addf %3, %5 : vector<128x256xf32>
    %7 = vector.extract_strided_slice %6 {offsets = [0, 0], sizes = [128, 128], strides = [1, 1]} : vector<128x256xf32> to vector<128x128xf32>
    %8 = arith.negf %7 : vector<128x128xf32>
    %9 = math.exp %8 : vector<128x128xf32>
    %cst_5 = arith.constant 1.000000e+00 : f32
    %10 = vector.broadcast %cst_5 : f32 to vector<128x128xf32>
    %11 = arith.addf %10, %9 : vector<128x128xf32>
    %12 = arith.divf %10, %11 : vector<128x128xf32>
    %c0_6 = arith.constant 0 : index
    %c0_7 = arith.constant 0 : index
    %13 = vector.load %arg4[%c0_6, %c0_7] : memref<128x256xf32, #tpu.memory_space<vmem>>, vector<128x128xf32>
    tpu.vector_store %arg4[%c0_6, %c0_7], %12 {strides = array<i32>} : memref<128x256xf32, #tpu.memory_space<vmem>>, vector<128x128xf32>,
    %14 = vector.extract_strided_slice %6 {offsets = [0, 128], sizes = [128, 128], strides = [1, 1]} : vector<128x256xf32> to vector<128x128xf32>
    %c0_8 = arith.constant 0 : index
    %c128 = arith.constant 128 : index
    %15 = vector.load %arg4[%c0_8, %c128] : memref<128x256xf32, #tpu.memory_space<vmem>>, vector<128x128xf32>
    tpu.vector_store %arg4[%c0_8, %c128], %14 {strides = array<i32>} : memref<128x256xf32, #tpu.memory_space<vmem>>, vector<128x128xf32>,
    return
  }
  func.func @transform_0(%arg0: i32) -> (i32, i32) {
    %c0_i32 = arith.constant 0 : i32
    %c0_i32_0 = arith.constant 0 : i32
    return %arg0, %c0_i32 : i32, i32
  }
  func.func @transform_1(%arg0: i32) -> (i32, i32) {
    %c0_i32 = arith.constant 0 : i32
    %c0_i32_0 = arith.constant 0 : i32
    %c0_i32_1 = arith.constant 0 : i32
    return %c0_i32, %c0_i32_0 : i32, i32
  }
  func.func @transform_2(%arg0: i32) -> (i32, i32) {
    %c0_i32 = arith.constant 0 : i32
    %c0_i32_0 = arith.constant 0 : i32
    %c0_i32_1 = arith.constant 0 : i32
    return %c0_i32, %c0_i32_0 : i32, i32
  }
  func.func @transform_3(%arg0: i32) -> (i32, i32) {
    %c0_i32 = arith.constant 0 : i32
    %c0_i32_0 = arith.constant 0 : i32
    return %arg0, %c0_i32 : i32, i32
  }
}

module attributes {stable_mosaic.version = 11 : i64} {
  func.func @_box_head_kernel(%arg0: i32, %arg1: memref<16x1568xf32, #tpu.memory_space<vmem>>, %arg2: memref<1568x128xbf16, #tpu.memory_space<vmem>>, %arg3: memref<1x128xf32, #tpu.memory_space<vmem>>, %arg4: memref<128x128xbf16, #tpu.memory_space<vmem>>, %arg5: memref<1x128xf32, #tpu.memory_space<vmem>>, %arg6: memref<128x256xbf16, #tpu.memory_space<vmem>>, %arg7: memref<1x256xf32, #tpu.memory_space<vmem>>, %arg8: memref<16x256xf32, #tpu.memory_space<vmem>>) attributes {dimension_semantics = [#tpu.dimension_semantics<parallel>], iteration_bounds = array<i64: 1>, scalar_prefetch = 0 : i64, scratch_operands = 0 : i64, tpu.core_type = #tpu.core_type<tc>, window_params = [{transform_indices = @transform_0, window_bounds = array<i64: 16, 1568>}, {pipeline_mode = #tpu.pipeline_mode<synchronous>, transform_indices = @transform_1, window_bounds = array<i64: 1568, 128>}, {pipeline_mode = #tpu.pipeline_mode<synchronous>, transform_indices = @transform_2, window_bounds = array<i64: 1, 128>}, {pipeline_mode = #tpu.pipeline_mode<synchronous>, transform_indices = @transform_3, window_bounds = array<i64: 128, 128>}, {pipeline_mode = #tpu.pipeline_mode<synchronous>, transform_indices = @transform_4, window_bounds = array<i64: 1, 128>}, {pipeline_mode = #tpu.pipeline_mode<synchronous>, transform_indices = @transform_5, window_bounds = array<i64: 128, 256>}, {pipeline_mode = #tpu.pipeline_mode<synchronous>, transform_indices = @transform_6, window_bounds = array<i64: 1, 256>}, {transform_indices = @transform_7, window_bounds = array<i64: 16, 256>}]} {
    %c0 = arith.constant 0 : index
    %c0_0 = arith.constant 0 : index
    %0 = vector.load %arg1[%c0, %c0_0] : memref<16x1568xf32, #tpu.memory_space<vmem>>, vector<16x1568xf32>
    %1 = arith.truncf %0 : vector<16x1568xf32> to vector<16x1568xbf16>
    %c0_1 = arith.constant 0 : index
    %c0_2 = arith.constant 0 : index
    %2 = vector.load %arg2[%c0_1, %c0_2] : memref<1568x128xbf16, #tpu.memory_space<vmem>>, vector<1568x128xbf16>
    %cst = arith.constant dense<0.000000e+00> : vector<16x128xf32>
    %3 = tpu.matmul %1, %2, %cst {dimension_numbers = #tpu.dot_dimension_numbers<[1], [0], [0], [1], [0, 0, 1, 1], [], []>} : vector<16x1568xbf16>, vector<1568x128xbf16>, vector<16x128xf32> -> vector<16x128xf32>
    %c0_3 = arith.constant 0 : index
    %c0_4 = arith.constant 0 : index
    %4 = vector.load %arg3[%c0_3, %c0_4] : memref<1x128xf32, #tpu.memory_space<vmem>>, vector<1x128xf32>
    %5 = vector.broadcast %4 : vector<1x128xf32> to vector<16x128xf32>
    %6 = arith.addf %3, %5 : vector<16x128xf32>
    %cst_5 = arith.constant 0.000000e+00 : f32
    %7 = vector.broadcast %cst_5 : f32 to vector<16x128xf32>
    %8 = arith.maximumf %6, %7 : vector<16x128xf32>
    %9 = arith.truncf %8 : vector<16x128xf32> to vector<16x128xbf16>
    %c0_6 = arith.constant 0 : index
    %c0_7 = arith.constant 0 : index
    %10 = vector.load %arg4[%c0_6, %c0_7] : memref<128x128xbf16, #tpu.memory_space<vmem>>, vector<128x128xbf16>
    %cst_8 = arith.constant dense<0.000000e+00> : vector<16x128xf32>
    %11 = tpu.matmul %9, %10, %cst_8 {dimension_numbers = #tpu.dot_dimension_numbers<[1], [0], [0], [1], [0, 0, 1, 1], [], []>} : vector<16x128xbf16>, vector<128x128xbf16>, vector<16x128xf32> -> vector<16x128xf32>
    %c0_9 = arith.constant 0 : index
    %c0_10 = arith.constant 0 : index
    %12 = vector.load %arg5[%c0_9, %c0_10] : memref<1x128xf32, #tpu.memory_space<vmem>>, vector<1x128xf32>
    %13 = vector.broadcast %12 : vector<1x128xf32> to vector<16x128xf32>
    %14 = arith.addf %11, %13 : vector<16x128xf32>
    %cst_11 = arith.constant 0.000000e+00 : f32
    %15 = vector.broadcast %cst_11 : f32 to vector<16x128xf32>
    %16 = arith.maximumf %14, %15 : vector<16x128xf32>
    %17 = arith.truncf %16 : vector<16x128xf32> to vector<16x128xbf16>
    %c0_12 = arith.constant 0 : index
    %c0_13 = arith.constant 0 : index
    %18 = vector.load %arg6[%c0_12, %c0_13] : memref<128x256xbf16, #tpu.memory_space<vmem>>, vector<128x256xbf16>
    %cst_14 = arith.constant dense<0.000000e+00> : vector<16x256xf32>
    %19 = tpu.matmul %17, %18, %cst_14 {dimension_numbers = #tpu.dot_dimension_numbers<[1], [0], [0], [1], [0, 0, 1, 1], [], []>} : vector<16x128xbf16>, vector<128x256xbf16>, vector<16x256xf32> -> vector<16x256xf32>
    %c0_15 = arith.constant 0 : index
    %c0_16 = arith.constant 0 : index
    %20 = vector.load %arg7[%c0_15, %c0_16] : memref<1x256xf32, #tpu.memory_space<vmem>>, vector<1x256xf32>
    %21 = vector.broadcast %20 : vector<1x256xf32> to vector<16x256xf32>
    %22 = arith.addf %19, %21 : vector<16x256xf32>
    %23 = vector.extract_strided_slice %22 {offsets = [0, 0], sizes = [16, 128], strides = [1, 1]} : vector<16x256xf32> to vector<16x128xf32>
    %cst_17 = arith.constant dense<0xFF800000> : vector<16xf32>
    %24 = vector.multi_reduction <maximumf>, %23, %cst_17 [1] : vector<16x128xf32> to vector<16xf32>
    %25 = vector.shape_cast %24 : vector<16xf32> to vector<16x1xf32>
    %26 = vector.broadcast %25 : vector<16x1xf32> to vector<16x128xf32>
    %27 = arith.subf %23, %26 : vector<16x128xf32>
    %28 = math.exp %27 : vector<16x128xf32>
    %cst_18 = arith.constant dense<0.000000e+00> : vector<16xf32>
    %29 = vector.multi_reduction <add>, %28, %cst_18 [1] : vector<16x128xf32> to vector<16xf32>
    %30 = vector.shape_cast %29 : vector<16xf32> to vector<16x1xf32>
    %31 = tpu.reciprocal %30 {approx = true} : vector<16x1xf32> -> vector<16x1xf32>
    %32 = vector.broadcast %31 : vector<16x1xf32> to vector<16x128xf32>
    %33 = arith.mulf %28, %32 : vector<16x128xf32>
    %c0_19 = arith.constant 0 : index
    %c0_20 = arith.constant 0 : index
    %34 = vector.load %arg8[%c0_19, %c0_20] : memref<16x256xf32, #tpu.memory_space<vmem>>, vector<16x128xf32>
    tpu.vector_store %arg8[%c0_19, %c0_20], %33 {strides = array<i32>} : memref<16x256xf32, #tpu.memory_space<vmem>>, vector<16x128xf32>,
    %35 = vector.extract_strided_slice %22 {offsets = [0, 128], sizes = [16, 128], strides = [1, 1]} : vector<16x256xf32> to vector<16x128xf32>
    %c0_21 = arith.constant 0 : index
    %c128 = arith.constant 128 : index
    %36 = vector.load %arg8[%c0_21, %c128] : memref<16x256xf32, #tpu.memory_space<vmem>>, vector<16x128xf32>
    tpu.vector_store %arg8[%c0_21, %c128], %35 {strides = array<i32>} : memref<16x256xf32, #tpu.memory_space<vmem>>, vector<16x128xf32>,
    return
  }
  func.func @transform_0(%arg0: i32) -> (i32, i32) {
    %c0_i32 = arith.constant 0 : i32
    %c0_i32_0 = arith.constant 0 : i32
    return %arg0, %c0_i32 : i32, i32
  }
  func.func @transform_1(%arg0: i32) -> (i32, i32) {
    %c0_i32 = arith.constant 0 : i32
    %c0_i32_0 = arith.constant 0 : i32
    %c0_i32_1 = arith.constant 0 : i32
    return %c0_i32, %c0_i32_0 : i32, i32
  }
  func.func @transform_2(%arg0: i32) -> (i32, i32) {
    %c0_i32 = arith.constant 0 : i32
    %c0_i32_0 = arith.constant 0 : i32
    %c0_i32_1 = arith.constant 0 : i32
    return %c0_i32, %c0_i32_0 : i32, i32
  }
  func.func @transform_3(%arg0: i32) -> (i32, i32) {
    %c0_i32 = arith.constant 0 : i32
    %c0_i32_0 = arith.constant 0 : i32
    %c0_i32_1 = arith.constant 0 : i32
    return %c0_i32, %c0_i32_0 : i32, i32
  }
  func.func @transform_4(%arg0: i32) -> (i32, i32) {
    %c0_i32 = arith.constant 0 : i32
    %c0_i32_0 = arith.constant 0 : i32
    %c0_i32_1 = arith.constant 0 : i32
    return %c0_i32, %c0_i32_0 : i32, i32
  }
  func.func @transform_5(%arg0: i32) -> (i32, i32) {
    %c0_i32 = arith.constant 0 : i32
    %c0_i32_0 = arith.constant 0 : i32
    %c0_i32_1 = arith.constant 0 : i32
    return %c0_i32, %c0_i32_0 : i32, i32
  }
  func.func @transform_6(%arg0: i32) -> (i32, i32) {
    %c0_i32 = arith.constant 0 : i32
    %c0_i32_0 = arith.constant 0 : i32
    %c0_i32_1 = arith.constant 0 : i32
    return %c0_i32, %c0_i32_0 : i32, i32
  }
  func.func @transform_7(%arg0: i32) -> (i32, i32) {
    %c0_i32 = arith.constant 0 : i32
    %c0_i32_0 = arith.constant 0 : i32
    return %arg0, %c0_i32 : i32, i32
  }
}

</mosaic_0001>

<bundles_post_ra>
// kernel: generalized_rcnn_forward.2
= control target key start
LH: loop header
LB: loop body
LE: loop exit
PB: predicated region body
PF: predicated region fallthrough
CT: control target
= control target key end

     0   :  { %vm69_vm0 = vcmask 261120   ;;  %s1077_s1 = inlined_call_operand.vmem [shape: bf16[32,256], index: 1, kind: input, shape index: {}]   ;;  %s1078_s0 = inlined_call_operand.vmem [shape: f32[128,32], index: 0, kind: input, shape index: {}]   ;;  %s1079_s2 = inlined_call_operand.vmem [shape: f32[1,256], index: 2, kind: input, shape index: {}]   ;;  %s1080_s3 = inlined_call_operand.vmem [shape: f32[128,256], index: 3, kind: output, shape index: {}]  }
   0x1   :  { %v542_v0 = vld [vmem:[%s1077_s1 + $0x10] sm:$0xf]  ;;  %v583_v1 = vld [vmem:[%s1077_s1 + $0x14] sm:$0xf0]  ;;  %v534_v2 = vld [vmem:[%s1077_s1] sm:$0xf] }
   0x2   :  { %v543_v3 = vor.u32 %v583_v1, %v542_v0  ;;  %v581_v4 = vld [vmem:[%s1077_s1 + $0x4] sm:$0xf0]  ;;  %v15_v5 = vld [vmem:[%s1078_s0] sm:$0xff]  ;;  %v582_v7 = vld [vmem:[%s1077_s1 + $0x14] sm:$0xf] }
   0x3   :  { %v16_v6 = vld [vmem:[%s1078_s0 + $0x8] sm:$0xff]  ;;  %v535_v8 = vor.u32 %v581_v4, %v534_v2  ;;  %v23_v9 = vld [vmem:[%s1078_s0 + $0x40] sm:$0xff]  ;;  %v544_v11 = vld [vmem:[%s1077_s1 + $0x18] sm:$0xf0] }
   0x4   :  { %100 = vmatpush.bf16.msra.mxu0 %v543_v3  ;;  %584 = vmatpush.bf16.msra.mxu2 %v543_v3  ;;  %v24_v10 = vld [vmem:[%s1078_s0 + $0x48] sm:$0xff]  ;;  %v547_v12 = vor.u32 %v582_v7, %v544_v11  ;;  %v580_v13 = vld [vmem:[%s1077_s1 + $0x4] sm:$0xf]  ;;  %v31_v15 = vpack.c.bf16 %v16_v6, %v15_v5  ;;  %v17_v18 = vld [vmem:[%s1078_s0 + $0x10] sm:$0xff] }
   0x5   :  { %v536_v14 = vld [vmem:[%s1077_s1 + $0x8] sm:$0xf0]  ;;  %v35_v16 = vpack.c.bf16 %v24_v10, %v23_v9  ;;  %v18_v19 = vld [vmem:[%s1078_s0 + $0x18] sm:$0xff]  ;;  %v25_v20 = vld [vmem:[%s1078_s0 + $0x50] sm:$0xff] }
   0x6   :  { %586 = vmatpush.bf16.msra.mxu3 %v547_v12  ;;  %149 = vmatpush.bf16.msra.mxu1 %v547_v12  ;;  %v539_v17 = vor.u32 %v580_v13, %v536_v14  ;;  %v26_v21 = vld [vmem:[%s1078_s0 + $0x58] sm:$0xff]  ;;  %v32_v22 = vpack.c.bf16 %v18_v19, %v17_v18  ;;  %v19_v24 = vld [vmem:[%s1078_s0 + $0x20] sm:$0xff]  ;;  %v20_v25 = vld [vmem:[%s1078_s0 + $0x28] sm:$0xff] }
   0x7   :  { %v36_v23 = vpack.c.bf16 %v26_v21, %v25_v20  ;;  %v27_v26 = vld [vmem:[%s1078_s0 + $0x60] sm:$0xff]  ;;  %v28_v27 = vld [vmem:[%s1078_s0 + $0x68] sm:$0xff]  ;;  %v33_v28 = vpack.c.bf16 %v20_v25, %v19_v24  ;;  %v21_v30 = vld [vmem:[%s1078_s0 + $0x30] sm:$0xff] }
   0x8   :  { %101 = vmatpush.bf16.msra.mxu0 %v535_v8  ;;  %585 = vmatpush.bf16.msra.mxu2 %v535_v8  ;;  %v37_v29 = vpack.c.bf16 %v28_v27, %v27_v26  ;;  %v22_v31 = vld [vmem:[%s1078_s0 + $0x38] sm:$0xff]  ;;  %v29_v32 = vld [vmem:[%s1078_s0 + $0x70] sm:$0xff]  ;;  %v43_v36 = vld [vmem:[%s1079_s2] sm:$0x3] }
   0x9   :  { %v30_v33 = vld [vmem:[%s1078_s0 + $0x78] sm:$0xff]  ;;  %v34_v34 = vpack.c.bf16 %v22_v31, %v21_v30  ;;  %v763_v37 = vperm.slane %v43_v36, 0  ;;  %v766_v43 = vperm.slane %v43_v36, 1 }
   0xa   :  { %587 = vmatpush.bf16.msra.mxu3 %v539_v17  ;;  %150 = vmatpush.bf16.msra.mxu1 %v539_v17  ;;  %v38_v35 = vpack.c.bf16 %v30_v33, %v29_v32 }
   0xb   :  { %548 = vmatmul.msk.bf16.vlgmr.msra.gmra.mxu0 %vm69_vm0, %v31_v15  ;;  %552 = vmatmul.msk.bf16.vlgmr.msra.gmra.mxu2 %vm69_vm0, %v35_v16 }
   0xd   :  { %560 = vmatmul.msk.bf16.vlgmr.msra.gmra.mxu3 %vm69_vm0, %v35_v16  ;;  %556 = vmatmul.msk.bf16.vlgmr.msra.gmra.mxu1 %vm69_vm0, %v31_v15 }
  0x1b   :  { %549 = vmatmul.msk.bf16.gmra.mxu0 %vm69_vm0, %v32_v22  ;;  %553 = vmatmul.msk.bf16.gmra.mxu2 %vm69_vm0, %v36_v23 }
  0x1d   :  { %561 = vmatmul.msk.bf16.gmra.mxu3 %vm69_vm0, %v36_v23  ;;  %557 = vmatmul.msk.bf16.gmra.mxu1 %vm69_vm0, %v32_v22 }
  0x2b   :  { %550 = vmatmul.msk.bf16.gmra.mxu0 %vm69_vm0, %v33_v28  ;;  %554 = vmatmul.msk.bf16.gmra.mxu2 %vm69_vm0, %v37_v29 }
  0x2d   :  { %562 = vmatmul.msk.bf16.gmra.mxu3 %vm69_vm0, %v37_v29  ;;  %558 = vmatmul.msk.bf16.gmra.mxu1 %vm69_vm0, %v33_v28 }
  0x3b   :  { %551 = vmatmul.msk.bf16.gmra.mxu0 %vm69_vm0, %v34_v34  ;;  %555 = vmatmul.msk.bf16.gmra.mxu2 %vm69_vm0, %v38_v35 }
  0x3d   :  { %563 = vmatmul.msk.bf16.gmra.mxu3 %vm69_vm0, %v38_v35  ;;  %559 = vmatmul.msk.bf16.gmra.mxu1 %vm69_vm0, %v34_v34 }
  0x88   :  { %v103_v38 = vpop.f32.mrf.mxu0 }
  0x89   :  { %v104_v39 = vadd.f32 %v103_v38, %v763_v37 }
  0x8a   :  { %v152_v41 = vpop.f32.mrf.mxu1 }
  0x8b   :  { %v564_v40 = vmul.f32 -1.442695, %v104_v39  ;;  %v153_v46 = vadd.f32 %v152_v41, %v766_v43 }
  0x8d   :  { %588 = vpow2.f32 %v564_v40  ;;  %512 = vst [vmem:[%s1080_s3 + $0x8] sm:$0xff] %v153_v46 }
  0x8e   :  { %v123_v42 = vpop.f32.mrf.mxu2 }
  0x8f   :  { %v124_v44 = vadd.f32 %v123_v42, %v763_v37 }
  0x90   :  { %v105_v45 = vpop.f32.mrf.mxu0  ;;  %v172_v49 = vpop.f32.mrf.mxu3 }
  0x91   :  { %v572_v47 = vmul.f32 -1.442695, %v124_v44  ;;  %v106_v48 = vadd.f32 %v105_v45, %v763_v37  ;;  %v173_v52 = vadd.f32 %v172_v49, %v766_v43 }
  0x92   :  { %v154_v54 = vpop.f32.mrf.mxu1 }
  0x93   :  { %v589_v50 = vpop.eup %588  ;;  %590 = vpow2.f32 %v572_v47  ;;  %v565_v51 = vmul.f32 -1.442695, %v106_v48  ;;  %520 = vst [vmem:[%s1080_s3 + $0x88] sm:$0xff] %v173_v52  ;;  %v155_v55 = vadd.f32 %v154_v54, %v766_v43 }
  0x94   :  { %v240_v53 = vadd.f32 1.0, %v589_v50 }
  0x95   :  { %592 = vpow2.f32 %v565_v51  ;;  %513 = vst [vmem:[%s1080_s3 + $0x18] sm:$0xff] %v155_v55 }
  0x96   :  { %594 = vrcp.f32 %v240_v53  ;;  %v125_v56 = vpop.f32.mrf.mxu2  ;;  %v265_v6 = vand.u32 2147483647, %v240_v53  ;;  %v267_v10 = vand.u32 2147483648, %v240_v53  ;;  %vm261_vm1 = vweird.f32 %v240_v53 }
  0x97   :  { %v126_v57 = vadd.f32 %v125_v56, %v763_v37 }
  0x98   :  { %v108_v58 = vpop.f32.mrf.mxu0  ;;  %v174_v63 = vpop.f32.mrf.mxu3  ;;  %vm795_vm3 = vcmp.eq.f32.partialorder %v265_v6, 8.507059e+37  ;;  %v268_v25 = vor.u32 1.1754944e-38, %v267_v10 }
  0x99   :  { %v591_v59 = vpop.eup %590  ;;  %v573_v60 = vmul.f32 -1.442695, %v126_v57  ;;  %v109_v61 = vadd.f32 %v108_v58, %v763_v37  ;;  %v175_v2 = vadd.f32 %v174_v63, %v766_v43 }
  0x9a   :  { %v784_v62 = vadd.f32 1.0, %v591_v59  ;;  %v157_v4 = vpop.f32.mrf.mxu1 }
  0x9b   :  { %v593_v0 = vpop.eup %592  ;;  %596 = vpow2.f32 %v573_v60  ;;  %v566_v1 = vmul.f32 -1.442695, %v109_v61  ;;  %521 = vst [vmem:[%s1080_s3 + $0x98] sm:$0xff] %v175_v2  ;;  %v158_v50 = vadd.f32 %v157_v4, %v766_v43 }
  0x9c   :  { %v595_v3 = vpop.eup %594  ;;  %598 = vrcp.f32 %v784_v62  ;;  %v788_v7 = vadd.f32 1.0, %v593_v0  ;;  %v385_v18 = vand.u32 2147483647, %v784_v62  ;;  %v387_v19 = vand.u32 2147483648, %v784_v62 }
  0x9d   :  { %v257_v5 = vmul.f32 %v595_v3, %v240_v53  ;;  %600 = vpow2.f32 %v566_v1  ;;  %vm262_vm2 = vweird.f32 %v595_v3  ;;  %vm381_vm4 = vweird.f32 %v784_v62  ;;  %514 = vst [vmem:[%s1080_s3 + $0x28] sm:$0xff] %v158_v50 }
  0x9e   :  { %v128_v8 = vpop.f32.mrf.mxu2  ;;  %602 = vrcp.f32 %v788_v7  ;;  %vm263_vm5 = vmor %vm261_vm1, %vm262_vm2  ;;  %v280_v27 = vand.u32 2147483647, %v788_v7  ;;  %v282_v28 = vand.u32 2147483648, %v788_v7  ;;  %vm814_vm6 = vcmp.eq.f32.partialorder %v385_v18, 8.507059e+37 }
  0x9f   :  { %v258_v9 = vsub.f32 1.0, %v257_v5  ;;  %v129_v11 = vadd.f32 %v128_v8, %v763_v37  ;;  %v388_v38 = vor.u32 1.1754944e-38, %v387_v19  ;;  %vm276_vm8 = vweird.f32 %v788_v7 }
  0xa0   :  { %v110_v12 = vpop.f32.mrf.mxu0  ;;  %v177_v22 = vpop.f32.mrf.mxu3  ;;  %vm824_vm9 = vcmp.eq.f32.partialorder %v280_v27, 8.507059e+37  ;;  %v283_v45 = vor.u32 1.1754944e-38, %v282_v28 }
  0xa1   :  { %v597_v13 = vpop.eup %596  ;;  %v259_v14 = vmul.f32 %v595_v3, %v258_v9  ;;  %v111_v16 = vadd.f32 %v110_v12, %v763_v37  ;;  %v574_v21 = vmul.f32 -1.442695, %v129_v11  ;;  %v178_v54 = vadd.f32 %v177_v22, %v766_v43 }
  0xa2   :  { %v599_v17 = vpop.eup %598  ;;  %v802_v20 = vadd.f32 1.0, %v597_v13  ;;  %v159_v30 = vpop.f32.mrf.mxu1 }
  0xa3   :  { %v601_v23 = vpop.eup %600  ;;  %v260_v24 = vadd.f32 %v595_v3, %v259_v14  ;;  %v377_v26 = vmul.f32 %v599_v17, %v784_v62  ;;  %v567_v29 = vmul.f32 -1.442695, %v111_v16  ;;  %vm382_vm7 = vweird.f32 %v599_v17  ;;  %522 = vst [vmem:[%s1080_s3 + $0xa8] sm:$0xff] %v178_v54 }
  0xa4   :  { %604 = vrcp.f32 %v802_v20  ;;  %v603_v31 = vpop.eup %602  ;;  %v810_v34 = vadd.f32 1.0, %v601_v23  ;;  %vm383_vm10 = vmor %vm381_vm4, %vm382_vm7  ;;  %v400_v53 = vand.u32 2147483647, %v802_v20  ;;  %v402_v59 = vand.u32 2147483648, %v802_v20 }
  0xa5   :  { %v264_v32 = vsel %vm263_vm5, %v595_v3, %v260_v24  ;;  %v378_v33 = vsub.f32 1.0, %v377_v26  ;;  %606 = vpow2.f32 %v574_v21  ;;  %v272_v39 = vmul.f32 %v603_v31, %v788_v7 }
  0xa6   :  { %v269_v35 = vsel %vm795_vm3, %v268_v25, %v264_v32  ;;  %v130_v40 = vpop.f32.mrf.mxu2  ;;  %608 = vrcp.f32 %v810_v34  ;;  %vm277_vm11 = vweird.f32 %v603_v31  ;;  %v160_v3 = vadd.f32 %v159_v30, %v766_v43 }
  0xa7   :  { %496 = vst [vmem:[%s1080_s3] sm:$0xff] %v269_v35  ;;  %v379_v41 = vmul.f32 %v599_v17, %v378_v33  ;;  %v273_v42 = vsub.f32 1.0, %v272_v39  ;;  %610 = vpow2.f32 %v567_v29  ;;  %v131_v48 = vadd.f32 %v130_v40, %v763_v37  ;;  %vm278_vm12 = vmor %vm276_vm8, %vm277_vm11 }
  0xa8   :  { %v113_v46 = vpop.f32.mrf.mxu0  ;;  %v179_v55 = vpop.f32.mrf.mxu3  ;;  %vm396_vm13 = vweird.f32 %v802_v20  ;;  %v295_v12 = vand.u32 2147483647, %v810_v34  ;;  %515 = vst [vmem:[%s1080_s3 + $0x38] sm:$0xff] %v160_v3  ;;  %vm867_vm15 = vcmp.eq.f32.partialorder %v400_v53, 8.507059e+37  ;;  %v403_v18 = vor.u32 1.1754944e-38, %v402_v59 }
  0xa9   :  { %v380_v47 = vadd.f32 %v599_v17, %v379_v41  ;;  %v114_v49 = vadd.f32 %v113_v46, %v763_v37  ;;  %v274_v52 = vmul.f32 %v603_v31, %v273_v42  ;;  %v575_v60 = vmul.f32 -1.442695, %v131_v48 }
  0xaa   :  { %v605_v51 = vpop.eup %604  ;;  %v180_v4 = vadd.f32 %v179_v55, %v766_v43  ;;  %v162_v5 = vpop.f32.mrf.mxu1  ;;  %v297_v19 = vand.u32 2147483648, %v810_v34  ;;  %vm291_vm1 = vweird.f32 %v810_v34  ;;  %vm882_vm3 = vcmp.eq.f32.partialorder %v295_v12, 8.507059e+37 }
  0xab   :  { %v607_v56 = vpop.eup %606  ;;  %v384_v57 = vsel %vm383_vm10, %v599_v17, %v380_v47  ;;  %v392_v58 = vmul.f32 %v605_v51, %v802_v20  ;;  %v275_v62 = vadd.f32 %v603_v31, %v274_v52  ;;  %v568_v0 = vmul.f32 -1.442695, %v114_v49 }
  0xac   :  { %v389_v61 = vsel %vm814_vm6, %v388_v38, %v384_v57  ;;  %v842_v63 = vadd.f32 1.0, %v607_v56  ;;  %v609_v1 = vpop.eup %608  ;;  %612 = vpow2.f32 %v575_v60  ;;  %vm397_vm14 = vweird.f32 %v605_v51  ;;  %523 = vst [vmem:[%s1080_s3 + $0xb8] sm:$0xff] %v180_v4 }
  0xad   :  { %504 = vst [vmem:[%s1080_s3 + $0x80] sm:$0xff] %v389_v61  ;;  %v393_v2 = vsub.f32 1.0, %v392_v58  ;;  %v611_v6 = vpop.eup %610  ;;  %v279_v8 = vsel %vm278_vm12, %v603_v31, %v275_v62  ;;  %v287_v9 = vmul.f32 %v609_v1, %v810_v34  ;;  %vm398_vm0 = vmor %vm396_vm13, %vm397_vm14  ;;  %vm292_vm2 = vweird.f32 %v609_v1 }
  0xae   :  { %614 = vrcp.f32 %v842_v63  ;;  %v133_v10 = vpop.f32.mrf.mxu2  ;;  %v284_v7 = vsel %vm824_vm9, %v283_v45, %v279_v8  ;;  %v871_v15 = vadd.f32 1.0, %v611_v6  ;;  %v415_v27 = vand.u32 2147483647, %v842_v63  ;;  %vm293_vm4 = vmor %vm291_vm1, %vm292_vm2 }
  0xaf   :  { %v394_v11 = vmul.f32 %v605_v51, %v393_v2  ;;  %497 = vst [vmem:[%s1080_s3 + $0x10] sm:$0xff] %v284_v7  ;;  %v288_v14 = vsub.f32 1.0, %v287_v9  ;;  %616 = vpow2.f32 %v568_v0  ;;  %v134_v21 = vadd.f32 %v133_v10, %v763_v37 }
  0xb0   :  { %v115_v16 = vpop.f32.mrf.mxu0  ;;  %618 = vrcp.f32 %v871_v15  ;;  %v182_v23 = vpop.f32.mrf.mxu3  ;;  %v298_v33 = vor.u32 1.1754944e-38, %v297_v19  ;;  %vm411_vm5 = vweird.f32 %v842_v63  ;;  %v417_v36 = vand.u32 2147483648, %v842_v63 }
  0xb1   :  { %v395_v17 = vadd.f32 %v605_v51, %v394_v11  ;;  %v289_v22 = vmul.f32 %v609_v1, %v288_v14  ;;  %v116_v28 = vadd.f32 %v115_v16, %v763_v37  ;;  %v576_v32 = vmul.f32 -1.442695, %v134_v21 }
  0xb2   :  { %v613_v24 = vpop.eup %612  ;;  %v310_v40 = vand.u32 2147483647, %v871_v15  ;;  %v312_v41 = vand.u32 2147483648, %v871_v15  ;;  %v164_v47 = vpop.f32.mrf.mxu1  ;;  %vm910_vm6 = vcmp.eq.f32.partialorder %v415_v27, 8.507059e+37  ;;  %v163_v52 = vadd.f32 %v162_v5, %v766_v43 }
  0xb3   :  { %v399_v25 = vsel %vm398_vm0, %v605_v51, %v395_v17  ;;  %v290_v30 = vadd.f32 %v609_v1, %v289_v22  ;;  %v890_v31 = vadd.f32 1.0, %v613_v24  ;;  %v569_v46 = vmul.f32 -1.442695, %v116_v28 }
  0xb4   :  { %v615_v29 = vpop.eup %614  ;;  %v404_v20 = vsel %vm867_vm15, %v403_v18, %v399_v25  ;;  %v418_v54 = vor.u32 1.1754944e-38, %v417_v36  ;;  %vm306_vm8 = vweird.f32 %v871_v15  ;;  %vm918_vm9 = vcmp.eq.f32.partialorder %v310_v40, 8.507059e+37  ;;  %516 = vst [vmem:[%s1080_s3 + $0x48] sm:$0xff] %v163_v52 }
  0xb5   :  { %505 = vst [vmem:[%s1080_s3 + $0x90] sm:$0xff] %v404_v20  ;;  %v407_v35 = vmul.f32 %v615_v29, %v842_v63  ;;  %v617_v38 = vpop.eup %616  ;;  %v294_v39 = vsel %vm293_vm4, %v609_v1, %v290_v30  ;;  %620 = vrcp.f32 %v890_v31  ;;  %vm412_vm7 = vweird.f32 %v615_v29 }
  0xb6   :  { %v135_v42 = vpop.f32.mrf.mxu2  ;;  %v299_v34 = vsel %vm882_vm3, %v298_v33, %v294_v39  ;;  %v905_v45 = vadd.f32 1.0, %v617_v38  ;;  %v619_v48 = vpop.eup %618  ;;  %622 = vpow2.f32 %v576_v32  ;;  %v313_v57 = vor.u32 1.1754944e-38, %v312_v41  ;;  %vm413_vm10 = vmor %vm411_vm5, %vm412_vm7 }
  0xb7   :  { %v408_v44 = vsub.f32 1.0, %v407_v35  ;;  %498 = vst [vmem:[%s1080_s3 + $0x20] sm:$0xff] %v299_v34  ;;  %v136_v50 = vadd.f32 %v135_v42, %v763_v37  ;;  %v302_v55 = vmul.f32 %v619_v48, %v871_v15  ;;  %v430_v0 = vand.u32 2147483647, %v890_v31 }
  0xb8   :  { %v118_v51 = vpop.f32.mrf.mxu0  ;;  %624 = vrcp.f32 %v905_v45  ;;  %v184_v58 = vpop.f32.mrf.mxu3  ;;  %v432_v1 = vand.u32 2147483648, %v890_v31  ;;  %v183_v3 = vadd.f32 %v182_v23, %v766_v43  ;;  %vm307_vm11 = vweird.f32 %v619_v48 }
  0xb9   :  { %v409_v53 = vmul.f32 %v615_v29, %v408_v44  ;;  %v303_v60 = vsub.f32 1.0, %v302_v55  ;;  %626 = vpow2.f32 %v569_v46  ;;  %v577_v61 = vmul.f32 -1.442695, %v136_v50  ;;  %vm308_vm13 = vmor %vm306_vm8, %vm307_vm11 }
  0xba   :  { %v119_v2 = vadd.f32 %v118_v51, %v763_v37  ;;  %524 = vst [vmem:[%s1080_s3 + $0xc8] sm:$0xff] %v183_v3  ;;  %v165_v7 = vadd.f32 %v164_v47, %v766_v43  ;;  %vm426_vm12 = vweird.f32 %v890_v31  ;;  %vm948_vm14 = vcmp.eq.f32.partialorder %v430_v0, 8.507059e+37  ;;  %v167_v23 = vpop.f32.mrf.mxu1 }
  0xbb   :  { %v410_v59 = vadd.f32 %v615_v29, %v409_v53  ;;  %v621_v62 = vpop.eup %620  ;;  %v304_v5 = vmul.f32 %v619_v48, %v303_v60  ;;  %628 = vpow2.f32 %v577_v61  ;;  %v185_v18 = vadd.f32 %v184_v58, %v766_v43 }
  0xbc   :  { %v422_v6 = vmul.f32 %v621_v62, %v890_v31  ;;  %v623_v8 = vpop.eup %622  ;;  %v570_v63 = vmul.f32 -1.442695, %v119_v2  ;;  %517 = vst [vmem:[%s1080_s3 + $0x58] sm:$0xff] %v165_v7  ;;  %vm427_vm15 = vweird.f32 %v621_v62  ;;  %v433_v25 = vor.u32 1.1754944e-38, %v432_v1 }
  0xbd   :  { %v414_v4 = vsel %vm413_vm10, %v615_v29, %v410_v59  ;;  %v305_v11 = vadd.f32 %v619_v48, %v304_v5  ;;  %v943_v13 = vadd.f32 1.0, %v623_v8  ;;  %vm321_vm0 = vweird.f32 %v905_v45  ;;  %525 = vst [vmem:[%s1080_s3 + $0xd8] sm:$0xff] %v185_v18  ;;  %vm428_vm1 = vmor %vm426_vm12, %vm427_vm15 }
  0xbe   :  { %v419_v9 = vsel %vm910_vm6, %v418_v54, %v414_v4  ;;  %v138_v10 = vpop.f32.mrf.mxu2  ;;  %v423_v12 = vsub.f32 1.0, %v422_v6  ;;  %v625_v14 = vpop.eup %624  ;;  %630 = vpow2.f32 %v570_v63  ;;  %v325_v20 = vand.u32 2147483647, %v905_v45 }
  0xbf   :  { %506 = vst [vmem:[%s1080_s3 + $0xa0] sm:$0xff] %v419_v9  ;;  %v139_v17 = vadd.f32 %v138_v10, %v763_v37  ;;  %v627_v19 = vpop.eup %626  ;;  %v309_v21 = vsel %vm308_vm13, %v619_v48, %v305_v11  ;;  %v317_v15 = vmul.f32 %v625_v14, %v905_v45  ;;  %632 = vrcp.f32 %v943_v13 }
  0xc0   :  { %v424_v22 = vmul.f32 %v621_v62, %v423_v12  ;;  %v314_v24 = vsel %vm918_vm9, %v313_v57, %v309_v21  ;;  %v120_v26 = vpop.f32.mrf.mxu0  ;;  %v187_v27 = vpop.f32.mrf.mxu3  ;;  %v969_v30 = vadd.f32 1.0, %v627_v19  ;;  %vm322_vm2 = vweird.f32 %v625_v14 }
  0xc1   :  { %499 = vst [vmem:[%s1080_s3 + $0x30] sm:$0xff] %v314_v24  ;;  %v318_v29 = vsub.f32 1.0, %v317_v15  ;;  %v629_v32 = vpop.eup %628  ;;  %v327_v33 = vand.u32 2147483648, %v905_v45  ;;  %v578_v35 = vmul.f32 -1.442695, %v139_v17  ;;  %v168_v36 = vadd.f32 %v167_v23, %v766_v43  ;;  %vm323_vm3 = vmor %vm321_vm0, %vm322_vm2 }
  0xc2   :  { %v425_v28 = vadd.f32 %v621_v62, %v424_v22  ;;  %634 = vrcp.f32 %v969_v30  ;;  %v121_v40 = vadd.f32 %v120_v26, %v763_v37  ;;  %v986_v34 = vadd.f32 1.0, %v629_v32  ;;  %v169_v61 = vpop.f32.mrf.mxu1 }
  0xc3   :  { %v319_v39 = vmul.f32 %v625_v14, %v318_v29  ;;  %518 = vst [vmem:[%s1080_s3 + $0x68] sm:$0xff] %v168_v36  ;;  %636 = vpow2.f32 %v578_v35  ;;  %vm326_vm4 = vcmp.eq.f32.partialorder %v325_v20, 8.507059e+37  ;;  %v328_v47 = vor.u32 1.1754944e-38, %v327_v33 }
  0xc4   :  { %v429_v38 = vsel %vm428_vm1, %v621_v62, %v425_v28  ;;  %v631_v41 = vpop.eup %630  ;;  %v445_v48 = vand.u32 2147483647, %v943_v13  ;;  %v447_v49 = vand.u32 2147483648, %v943_v13  ;;  %638 = vrcp.f32 %v986_v34 }
  0xc5   :  { %v434_v42 = vsel %vm948_vm14, %v433_v25, %v429_v38  ;;  %v320_v31 = vadd.f32 %v625_v14, %v319_v39  ;;  %v988_v44 = vadd.f32 1.0, %v631_v41  ;;  %v633_v46 = vpop.eup %632  ;;  %v571_v53 = vmul.f32 -1.442695, %v121_v40 }
  0xc6   :  { %507 = vst [vmem:[%s1080_s3 + $0xb0] sm:$0xff] %v434_v42  ;;  %v140_v50 = vpop.f32.mrf.mxu2  ;;  %v437_v52 = vmul.f32 %v633_v46, %v943_v13  ;;  %vm441_vm5 = vweird.f32 %v943_v13  ;;  %vm1003_vm6 = vcmp.eq.f32.partialorder %v445_v48, 8.507059e+37  ;;  %v448_v58 = vor.u32 1.1754944e-38, %v447_v49 }
  0xc7   :  { %v324_v51 = vsel %vm323_vm3, %v625_v14, %v320_v31  ;;  %640 = vrcp.f32 %v988_v44  ;;  %v141_v56 = vadd.f32 %v140_v50, %v763_v37  ;;  %v340_v60 = vand.u32 2147483647, %v969_v30 }
  0xc8   :  { %v329_v54 = vsel %vm326_vm4, %v328_v47, %v324_v51  ;;  %v635_v55 = vpop.eup %634  ;;  %v438_v45 = vsub.f32 1.0, %v437_v52  ;;  %v189_v62 = vpop.f32.mrf.mxu3  ;;  %vm442_vm7 = vweird.f32 %v633_v46  ;;  %v342_v2 = vand.u32 2147483648, %v969_v30 }
  0xc9   :  { %500 = vst [vmem:[%s1080_s3 + $0x40] sm:$0xff] %v329_v54  ;;  %v332_v59 = vmul.f32 %v635_v55, %v969_v30  ;;  %v637_v0 = vpop.eup %636  ;;  %642 = vpow2.f32 %v571_v53  ;;  %vm336_vm8 = vweird.f32 %v969_v30  ;;  %v188_v4 = vadd.f32 %v187_v27, %v766_v43  ;;  %vm443_vm9 = vmor %vm441_vm5, %vm442_vm7 }
  0xca   :  { %v439_v1 = vmul.f32 %v633_v46, %v438_v45  ;;  %v1011_v37 = vadd.f32 1.0, %v637_v0  ;;  %v639_v5 = vpop.eup %638  ;;  %v579_v8 = vmul.f32 -1.442695, %v141_v56  ;;  %v170_v9 = vadd.f32 %v169_v61, %v766_v43 }
  0xcb   :  { %v333_v3 = vsub.f32 1.0, %v332_v59  ;;  %v190_v63 = vadd.f32 %v189_v62, %v766_v43  ;;  %vm337_vm10 = vweird.f32 %v635_v55  ;;  %v452_v7 = vmul.f32 %v639_v5, %v986_v34  ;;  %526 = vst [vmem:[%s1080_s3 + $0xe8] sm:$0xff] %v188_v4 }
  0xcc   :  { %v440_v6 = vadd.f32 %v633_v46, %v439_v1  ;;  %644 = vrcp.f32 %v1011_v37  ;;  %vm1023_vm11 = vcmp.eq.f32.partialorder %v340_v60, 8.507059e+37  ;;  %v343_v43 = vor.u32 1.1754944e-38, %v342_v2  ;;  %519 = vst [vmem:[%s1080_s3 + $0x78] sm:$0xff] %v170_v9  ;;  %vm338_vm13 = vmor %vm336_vm8, %vm337_vm10 }
  0xcd   :  { %v334_v10 = vmul.f32 %v635_v55, %v333_v3  ;;  %v641_v11 = vpop.eup %640  ;;  %vm456_vm12 = vweird.f32 %v986_v34  ;;  %v453_v17 = vsub.f32 1.0, %v452_v7  ;;  %527 = vst [vmem:[%s1080_s3 + $0xf8] sm:$0xff] %v190_v63  ;;  %vm457_vm14 = vweird.f32 %v639_v5 }
  0xce   :  { %v444_v12 = vsel %vm443_vm9, %v633_v46, %v440_v6  ;;  %v347_v18 = vmul.f32 %v641_v11, %v988_v44  ;;  %v460_v21 = vand.u32 2147483647, %v986_v34  ;;  %v462_v22 = vand.u32 2147483648, %v986_v34  ;;  %vm458_vm1 = vmor %vm456_vm12, %vm457_vm14 }
  0xcf   :  { %v449_v13 = vsel %vm1003_vm6, %v448_v58, %v444_v12  ;;  %v335_v16 = vadd.f32 %v635_v55, %v334_v10  ;;  %v643_v19 = vpop.eup %642  ;;  %646 = vpow2.f32 %v579_v8  ;;  %v454_v23 = vmul.f32 %v639_v5, %v453_v17 }
  0xd0   :  { %508 = vst [vmem:[%s1080_s3 + $0xc0] sm:$0xff] %v449_v13  ;;  %v348_v24 = vsub.f32 1.0, %v347_v18  ;;  %v247_v25 = vadd.f32 1.0, %v643_v19  ;;  %vm351_vm15 = vweird.f32 %v988_v44  ;;  %v355_v27 = vand.u32 2147483647, %v988_v44 }
  0xd1   :  { %v339_v15 = vsel %vm338_vm13, %v635_v55, %v335_v16  ;;  %v357_v28 = vand.u32 2147483648, %v988_v44  ;;  %v455_v20 = vadd.f32 %v639_v5, %v454_v23  ;;  %vm352_vm0 = vweird.f32 %v641_v11 }
  0xd2   :  { %v344_v26 = vsel %vm1023_vm11, %v343_v43, %v339_v15  ;;  %v645_v29 = vpop.eup %644  ;;  %v349_v30 = vmul.f32 %v641_v11, %v348_v24  ;;  %648 = vrcp.f32 %v247_v25  ;;  %v463_v32 = vor.u32 1.1754944e-38, %v462_v22  ;;  %vm353_vm3 = vmor %vm351_vm15, %vm352_vm0 }
  0xd3   :  { %501 = vst [vmem:[%s1080_s3 + $0x50] sm:$0xff] %v344_v26  ;;  %v467_v33 = vmul.f32 %v645_v29, %v1011_v37  ;;  %v459_v35 = vsel %vm458_vm1, %v639_v5, %v455_v20  ;;  %vm461_vm2 = vcmp.eq.f32.partialorder %v460_v21, 8.507059e+37  ;;  %v358_v40 = vor.u32 1.1754944e-38, %v357_v28 }
  0xd4   :  { %v350_v36 = vadd.f32 %v641_v11, %v349_v30  ;;  %v464_v39 = vsel %vm461_vm2, %v463_v32, %v459_v35  ;;  %vm356_vm4 = vcmp.eq.f32.partialorder %v355_v27, 8.507059e+37  ;;  %v477_v31 = vand.u32 2147483648, %v1011_v37 }
  0xd5   :  { %v647_v38 = vpop.eup %646  ;;  %v468_v41 = vsub.f32 1.0, %v467_v33  ;;  %509 = vst [vmem:[%s1080_s3 + $0xd0] sm:$0xff] %v464_v39  ;;  %vm472_vm5 = vweird.f32 %v645_v29  ;;  %v475_v48 = vand.u32 2147483647, %v1011_v37  ;;  %vm471_vm6 = vweird.f32 %v1011_v37 }
  0xd6   :  { %v354_v42 = vsel %vm353_vm3, %v641_v11, %v350_v36  ;;  %v255_v34 = vadd.f32 1.0, %v647_v38  ;;  %vm473_vm7 = vmor %vm471_vm6, %vm472_vm5  ;;  %v478_v51 = vor.u32 1.1754944e-38, %v477_v31  ;;  %v372_v55 = vand.u32 2147483648, %v247_v25 }
  0xd7   :  { %v359_v46 = vsel %vm356_vm4, %v358_v40, %v354_v42  ;;  %v469_v47 = vmul.f32 %v645_v29, %v468_v41  ;;  %vm476_vm8 = vcmp.eq.f32.partialorder %v475_v48, 8.507059e+37  ;;  %v370_v56 = vand.u32 2147483647, %v247_v25 }
  0xd8   :  { %v649_v49 = vpop.eup %648  ;;  %502 = vst [vmem:[%s1080_s3 + $0x60] sm:$0xff] %v359_v46  ;;  %650 = vrcp.f32 %v255_v34  ;;  %vm366_vm10 = vweird.f32 %v247_v25  ;;  %v373_v60 = vor.u32 1.1754944e-38, %v372_v55  ;;  %v492_v1 = vand.u32 2147483648, %v255_v34 }
  0xd9   :  { %v470_v44 = vadd.f32 %v645_v29, %v469_v47  ;;  %v362_v50 = vmul.f32 %v649_v49, %v247_v25  ;;  %vm367_vm9 = vweird.f32 %v649_v49  ;;  %vm371_vm12 = vcmp.eq.f32.partialorder %v370_v56, 8.507059e+37 }
  0xda   :  { %vm368_vm11 = vmor %vm366_vm10, %vm367_vm9  ;;  %v490_v3 = vand.u32 2147483647, %v255_v34  ;;  %vm486_vm14 = vweird.f32 %v255_v34  ;;  %v493_v4 = vor.u32 1.1754944e-38, %v492_v1 }
  0xdb   :  { %v474_v52 = vsel %vm473_vm7, %v645_v29, %v470_v44  ;;  %v363_v53 = vsub.f32 1.0, %v362_v50 }
  0xdc   :  { %v479_v54 = vsel %vm476_vm8, %v478_v51, %v474_v52  ;;  %vm491_vm0 = vcmp.eq.f32.partialorder %v490_v3, 8.507059e+37 }
  0xdd   :  { %510 = vst [vmem:[%s1080_s3 + $0xe0] sm:$0xff] %v479_v54  ;;  %v364_v45 = vmul.f32 %v649_v49, %v363_v53 }
  0xde   :  { %v651_v57 = vpop.eup %650 }
  0xdf   :  { %v365_v58 = vadd.f32 %v649_v49, %v364_v45  ;;  %v482_v59 = vmul.f32 %v651_v57, %v255_v34  ;;  %vm487_vm13 = vweird.f32 %v651_v57 }
  0xe0   :  { %vm488_vm15 = vmor %vm486_vm14, %vm487_vm13 }
  0xe1   :  { %v369_v61 = vsel %vm368_vm11, %v649_v49, %v365_v58  ;;  %v483_v62 = vsub.f32 1.0, %v482_v59 }
  0xe2   :  { %v374_v0 = vsel %vm371_vm12, %v373_v60, %v369_v61 }
  0xe3   :  { %503 = vst [vmem:[%s1080_s3 + $0x70] sm:$0xff] %v374_v0  ;;  %v484_v2 = vmul.f32 %v651_v57, %v483_v62 }
  0xe5   :  { %v485_v37 = vadd.f32 %v651_v57, %v484_v2 }
  0xe7   :  { %v489_v5 = vsel %vm488_vm15, %v651_v57, %v485_v37 }
  0xe8   :  { %v494_v6 = vsel %vm491_vm0, %v493_v4, %v489_v5 }
  0xe9   :  { %511 = vst [vmem:[%s1080_s3 + $0xf0] sm:$0xff] %v494_v6 }

// kernel: generalized_rcnn_forward.3
= control target key start
LH: loop header
LB: loop body
LE: loop exit
PB: predicated region body
PF: predicated region fallthrough
CT: control target
= control target key end

     0   :  { %vm854_vm0 = vcmask 261120   ;;  %s2458_s1 = inlined_call_operand.vmem [shape: bf16[1568,128], index: 1, kind: input, shape index: {}]   ;;  %s2459_s2 = inlined_call_operand.vmem [shape: f32[1,128], index: 2, kind: input, shape index: {}]   ;;  %s2460_s0 = inlined_call_operand.vmem [shape: f32[16,1568], index: 0, kind: input, shape index: {}]   ;;  %s2461_s4 = inlined_call_operand.vmem [shape: f32[1,128], index: 4, kind: input, shape index: {}]   ;;  %s2462_s3 = inlined_call_operand.vmem [shape: bf16[128,128], index: 3, kind: input, shape index: {}]   ;;  %s2463_s5 = inlined_call_operand.vmem [shape: bf16[128,256], index: 5, kind: input, shape index: {}]   ;;  %s2464_s6 = inlined_call_operand.vmem [shape: f32[1,256], index: 6, kind: input, shape index: {}]   ;;  %s2465_s7 = inlined_call_operand.vmem [shape: f32[16,256], index: 7, kind: output, shape index: {}]  }
   0x1   :  { %v1780_v0 = vld [vmem:[%s2458_s1 + $0x38] sm:$0xff]  ;;  %v1779_v4 = vld [vmem:[%s2458_s1 + $0x30] sm:$0xff]  ;;  %v1778_v8 = vld [vmem:[%s2458_s1 + $0x28] sm:$0xff] }
   0x2   :  { %v1796_v1 = vld [vmem:[%s2458_s1 + $0xb8] sm:$0xff]  ;;  %858 = vmatpush.bf16.msra.mxu0 %v1780_v0  ;;  %v1795_v5 = vld [vmem:[%s2458_s1 + $0xb0] sm:$0xff]  ;;  %v1794_v9 = vld [vmem:[%s2458_s1 + $0xa8] sm:$0xff] }
   0x3   :  { %v1804_v2 = vld [vmem:[%s2458_s1 + $0xf8] sm:$0xff]  ;;  %886 = vmatpush.bf16.msra.mxu2 %v1796_v1  ;;  %v1803_v6 = vld [vmem:[%s2458_s1 + $0xf0] sm:$0xff]  ;;  %v1802_v10 = vld [vmem:[%s2458_s1 + $0xe8] sm:$0xff] }
   0x4   :  { %v1788_v3 = vld [vmem:[%s2458_s1 + $0x78] sm:$0xff]  ;;  %900 = vmatpush.bf16.msra.mxu3 %v1804_v2  ;;  %v1787_v7 = vld [vmem:[%s2458_s1 + $0x70] sm:$0xff]  ;;  %v1786_v11 = vld [vmem:[%s2458_s1 + $0x68] sm:$0xff] }
   0x5   :  { %872 = vmatpush.bf16.msra.mxu1 %v1788_v3  ;;  %v1777_v12 = vld [vmem:[%s2458_s1 + $0x20] sm:$0xff]  ;;  %v1776_v16 = vld [vmem:[%s2458_s1 + $0x18] sm:$0xff]  ;;  %v1775_v20 = vld [vmem:[%s2458_s1 + $0x10] sm:$0xff] }
   0x6   :  { %859 = vmatpush.bf16.msra.mxu0 %v1779_v4  ;;  %v1793_v13 = vld [vmem:[%s2458_s1 + $0xa0] sm:$0xff]  ;;  %v1792_v17 = vld [vmem:[%s2458_s1 + $0x98] sm:$0xff]  ;;  %v1791_v21 = vld [vmem:[%s2458_s1 + $0x90] sm:$0xff] }
   0x7   :  { %887 = vmatpush.bf16.msra.mxu2 %v1795_v5  ;;  %v1801_v14 = vld [vmem:[%s2458_s1 + $0xe0] sm:$0xff]  ;;  %v1800_v18 = vld [vmem:[%s2458_s1 + $0xd8] sm:$0xff]  ;;  %v1799_v22 = vld [vmem:[%s2458_s1 + $0xd0] sm:$0xff] }
   0x8   :  { %901 = vmatpush.bf16.msra.mxu3 %v1803_v6  ;;  %v1785_v15 = vld [vmem:[%s2458_s1 + $0x60] sm:$0xff]  ;;  %v1784_v19 = vld [vmem:[%s2458_s1 + $0x58] sm:$0xff]  ;;  %v1783_v23 = vld [vmem:[%s2458_s1 + $0x50] sm:$0xff] }
   0x9   :  { %873 = vmatpush.bf16.msra.mxu1 %v1787_v7  ;;  %v1774_v24 = vld [vmem:[%s2458_s1 + $0x8] sm:$0xff]  ;;  %v1773_v28 = vld [vmem:[%s2458_s1] sm:$0xff]  ;;  %v1812_v31 = vld [vmem:[%s2458_s1 + $0x138] sm:$0xff] }
   0xa   :  { %860 = vmatpush.bf16.msra.mxu0 %v1778_v8  ;;  %v1790_v25 = vld [vmem:[%s2458_s1 + $0x88] sm:$0xff]  ;;  %v1789_v29 = vld [vmem:[%s2458_s1 + $0x80] sm:$0xff]  ;;  %v1828_v34 = vld [vmem:[%s2458_s1 + $0x1b8] sm:$0xff] }
   0xb   :  { %888 = vmatpush.bf16.msra.mxu2 %v1794_v9  ;;  %v1798_v26 = vld [vmem:[%s2458_s1 + $0xc8] sm:$0xff]  ;;  %v1797_v30 = vld [vmem:[%s2458_s1 + $0xc0] sm:$0xff]  ;;  %v29_v35 = vld [vmem:[%s2460_s0 + $0x10] sm:$0xff] }
   0xc   :  { %902 = vmatpush.bf16.msra.mxu3 %v1802_v10  ;;  %v1782_v27 = vld [vmem:[%s2458_s1 + $0x48] sm:$0xff]  ;;  %v27_v32 = vld [vmem:[%s2460_s0] sm:$0xff]  ;;  %v42_v36 = vld [vmem:[%s2460_s0 + $0x78] sm:$0xff] }
   0xd   :  { %874 = vmatpush.bf16.msra.mxu1 %v1786_v11  ;;  %v40_v33 = vld [vmem:[%s2460_s0 + $0x68] sm:$0xff]  ;;  %v1836_v37 = vld [vmem:[%s2458_s1 + $0x1f8] sm:$0xff]  ;;  %v43_v39 = vld [vmem:[%s2460_s0 + $0x80] sm:$0xff]  ;;  %v55_v43 = vpack.c.bf16 %v42_v36, %v29_v35 }
   0xe   :  { %861 = vmatpush.bf16.msra.mxu0 %v1777_v12  ;;  %v30_v38 = vld [vmem:[%s2460_s0 + $0x18] sm:$0xff]  ;;  %v1781_v40 = vld [vmem:[%s2458_s1 + $0x40] sm:$0xff]  ;;  %v53_v41 = vpack.c.bf16 %v40_v33, %v27_v32  ;;  %v28_v44 = vld [vmem:[%s2460_s0 + $0x8] sm:$0xff] }
   0xf   :  { %889 = vmatpush.bf16.msra.mxu2 %v1793_v13  ;;  %v1820_v42 = vld [vmem:[%s2458_s1 + $0x178] sm:$0xff]  ;;  %v41_v45 = vld [vmem:[%s2460_s0 + $0x70] sm:$0xff]  ;;  %v56_v47 = vpack.c.bf16 %v43_v39, %v30_v38  ;;  %v1810_v52 = vld [vmem:[%s2458_s1 + $0x128] sm:$0xff] }
  0x10   :  { %903 = vmatpush.bf16.msra.mxu3 %v1801_v14  ;;  %v1811_v46 = vld [vmem:[%s2458_s1 + $0x130] sm:$0xff]  ;;  %v54_v50 = vpack.c.bf16 %v41_v45, %v28_v44  ;;  %v1826_v53 = vld [vmem:[%s2458_s1 + $0x1a8] sm:$0xff]  ;;  %v1809_v56 = vld [vmem:[%s2458_s1 + $0x120] sm:$0xff] }
  0x11   :  { %875 = vmatpush.bf16.msra.mxu1 %v1785_v15  ;;  %v1827_v48 = vld [vmem:[%s2458_s1 + $0x1b0] sm:$0xff]  ;;  %v1834_v54 = vld [vmem:[%s2458_s1 + $0x1e8] sm:$0xff]  ;;  %v1825_v57 = vld [vmem:[%s2458_s1 + $0x1a0] sm:$0xff] }
  0x12   :  { %862 = vmatpush.bf16.msra.mxu0 %v1776_v16  ;;  %v1835_v49 = vld [vmem:[%s2458_s1 + $0x1f0] sm:$0xff]  ;;  %v1818_v55 = vld [vmem:[%s2458_s1 + $0x168] sm:$0xff]  ;;  %v1833_v58 = vld [vmem:[%s2458_s1 + $0x1e0] sm:$0xff] }
  0x13   :  { %890 = vmatpush.bf16.msra.mxu2 %v1792_v17  ;;  %v1819_v51 = vld [vmem:[%s2458_s1 + $0x170] sm:$0xff]  ;;  %v1817_v59 = vld [vmem:[%s2458_s1 + $0x160] sm:$0xff]  ;;  %v1808_v60 = vld [vmem:[%s2458_s1 + $0x118] sm:$0xff] }
  0x14   :  { %904 = vmatpush.bf16.msra.mxu3 %v1800_v18  ;;  %v1824_v61 = vld [vmem:[%s2458_s1 + $0x198] sm:$0xff]  ;;  %v1807_v0 = vld [vmem:[%s2458_s1 + $0x110] sm:$0xff]  ;;  %v1806_v4 = vld [vmem:[%s2458_s1 + $0x108] sm:$0xff] }
  0x15   :  { %876 = vmatpush.bf16.msra.mxu1 %v1784_v19  ;;  %v1832_v62 = vld [vmem:[%s2458_s1 + $0x1d8] sm:$0xff]  ;;  %v1823_v1 = vld [vmem:[%s2458_s1 + $0x190] sm:$0xff]  ;;  %v1822_v5 = vld [vmem:[%s2458_s1 + $0x188] sm:$0xff] }
  0x16   :  { %863 = vmatpush.bf16.msra.mxu0 %v1775_v20  ;;  %v1816_v63 = vld [vmem:[%s2458_s1 + $0x158] sm:$0xff]  ;;  %v1831_v2 = vld [vmem:[%s2458_s1 + $0x1d0] sm:$0xff]  ;;  %v1830_v6 = vld [vmem:[%s2458_s1 + $0x1c8] sm:$0xff] }
  0x17   :  { %891 = vmatpush.bf16.msra.mxu2 %v1791_v21  ;;  %v1815_v3 = vld [vmem:[%s2458_s1 + $0x150] sm:$0xff]  ;;  %v1814_v7 = vld [vmem:[%s2458_s1 + $0x148] sm:$0xff]  ;;  %v1805_v8 = vld [vmem:[%s2458_s1 + $0x100] sm:$0xff] }
  0x18   :  { %905 = vmatpush.bf16.msra.mxu3 %v1799_v22  ;;  %v1821_v9 = vld [vmem:[%s2458_s1 + $0x180] sm:$0xff]  ;;  %v1844_v11 = vld [vmem:[%s2458_s1 + $0x238] sm:$0xff]  ;;  %v44_v14 = vld [vmem:[%s2460_s0 + $0x88] sm:$0xff] }
  0x19   :  { %877 = vmatpush.bf16.msra.mxu1 %v1783_v23  ;;  %v1829_v10 = vld [vmem:[%s2458_s1 + $0x1c0] sm:$0xff]  ;;  %v1860_v12 = vld [vmem:[%s2458_s1 + $0x2b8] sm:$0xff]  ;;  %v33_v15 = vld [vmem:[%s2460_s0 + $0x30] sm:$0xff] }
  0x1a   :  { %864 = vmatpush.bf16.msra.mxu0 %v1774_v24  ;;  %v31_v13 = vld [vmem:[%s2460_s0 + $0x20] sm:$0xff]  ;;  %v46_v16 = vld [vmem:[%s2460_s0 + $0x98] sm:$0xff]  ;;  %v32_v21 = vld [vmem:[%s2460_s0 + $0x28] sm:$0xff] }
  0x1b   :  { %892 = vmatpush.bf16.msra.mxu2 %v1790_v25  ;;  %v1868_v17 = vld [vmem:[%s2458_s1 + $0x2f8] sm:$0xff]  ;;  %v47_v19 = vld [vmem:[%s2460_s0 + $0xa0] sm:$0xff]  ;;  %v45_v22 = vld [vmem:[%s2460_s0 + $0x90] sm:$0xff]  ;;  %v57_v23 = vpack.c.bf16 %v44_v14, %v31_v13  ;;  %v59_v24 = vpack.c.bf16 %v46_v16, %v33_v15 }
  0x1c   :  { %906 = vmatpush.bf16.msra.mxu3 %v1798_v26  ;;  %v34_v18 = vld [vmem:[%s2460_s0 + $0x38] sm:$0xff]  ;;  %v1813_v20 = vld [vmem:[%s2458_s1 + $0x140] sm:$0xff]  ;;  %v1842_v32 = vld [vmem:[%s2458_s1 + $0x228] sm:$0xff] }
  0x1d   :  { %878 = vmatpush.bf16.msra.mxu1 %v1782_v27  ;;  %v1852_v25 = vld [vmem:[%s2458_s1 + $0x278] sm:$0xff]  ;;  %v60_v26 = vpack.c.bf16 %v47_v19, %v34_v18  ;;  %v58_v27 = vpack.c.bf16 %v45_v22, %v32_v21  ;;  %v1858_v33 = vld [vmem:[%s2458_s1 + $0x2a8] sm:$0xff]  ;;  %v1841_v36 = vld [vmem:[%s2458_s1 + $0x220] sm:$0xff] }
  0x1e   :  { %865 = vmatpush.bf16.msra.mxu0 %v1773_v28  ;;  %v1843_v28 = vld [vmem:[%s2458_s1 + $0x230] sm:$0xff]  ;;  %v1850_v35 = vld [vmem:[%s2458_s1 + $0x268] sm:$0xff]  ;;  %v1865_v38 = vld [vmem:[%s2458_s1 + $0x2e0] sm:$0xff] }
  0x1f   :  { %893 = vmatpush.bf16.msra.mxu2 %v1789_v29  ;;  %v1859_v29 = vld [vmem:[%s2458_s1 + $0x2b0] sm:$0xff]  ;;  %v1849_v39 = vld [vmem:[%s2458_s1 + $0x260] sm:$0xff]  ;;  %v1876_v16 = vld [vmem:[%s2462_s3 + $0x28] sm:$0xff] }
  0x20   :  { %907 = vmatpush.bf16.msra.mxu3 %v1797_v30  ;;  %v1867_v30 = vld [vmem:[%s2458_s1 + $0x2f0] sm:$0xff]  ;;  %v1895_v18 = vld [vmem:[%s2459_s2] ss:$0 sm:$0xff] }
  0x21   :  { %879 = vmatpush.bf16.msra.mxu1 %v1781_v40  ;;  %866 = vmatmul.bf16.vlgmr.msra.gmra.mxu0 %v53_v41  ;;  %v1840_v40 = vld [vmem:[%s2458_s1 + $0x218] sm:$0xff]  ;;  %v1839_v44 = vld [vmem:[%s2458_s1 + $0x210] sm:$0xff] }
  0x22   :  { %914 = vmatpush.bf16.msrb.mxu0 %v1812_v31  ;;  %894 = vmatmul.bf16.vlgmr.msra.gmra.mxu2 %v55_v43  ;;  %v1851_v31 = vld [vmem:[%s2458_s1 + $0x270] sm:$0xff]  ;;  %v1856_v41 = vld [vmem:[%s2458_s1 + $0x298] sm:$0xff] }
  0x23   :  { %942 = vmatpush.bf16.msrb.mxu2 %v1828_v34  ;;  %908 = vmatmul.bf16.vlgmr.msra.gmra.mxu3 %v56_v47  ;;  %v1866_v34 = vld [vmem:[%s2458_s1 + $0x2e8] sm:$0xff]  ;;  %v1848_v43 = vld [vmem:[%s2458_s1 + $0x258] sm:$0xff]  ;;  %v1855_v45 = vld [vmem:[%s2458_s1 + $0x290] sm:$0xff] }
  0x24   :  { %956 = vmatpush.bf16.msrb.mxu3 %v1836_v37  ;;  %880 = vmatmul.bf16.vlgmr.msra.gmra.mxu1 %v54_v50  ;;  %v1857_v37 = vld [vmem:[%s2458_s1 + $0x2a0] sm:$0xff]  ;;  %v1847_v47 = vld [vmem:[%s2458_s1 + $0x250] sm:$0xff]  ;;  %v1862_v50 = vld [vmem:[%s2458_s1 + $0x2c8] sm:$0xff] }
  0x25   :  { %928 = vmatpush.bf16.msrb.mxu1 %v1820_v42  ;;  %v1864_v42 = vld [vmem:[%s2458_s1 + $0x2d8] sm:$0xff]  ;;  %v1877_v13 = vld [vmem:[%s2462_s3 + $0x30] sm:$0xff] }
  0x26   :  { %915 = vmatpush.bf16.msrb.mxu0 %v1811_v46  ;;  %v1863_v46 = vld [vmem:[%s2458_s1 + $0x2d0] sm:$0xff] }
  0x27   :  { %943 = vmatpush.bf16.msrb.mxu2 %v1827_v48  ;;  %v1838_v48 = vld [vmem:[%s2458_s1 + $0x208] sm:$0xff] }
  0x28   :  { %957 = vmatpush.bf16.msrb.mxu3 %v1835_v49  ;;  %v1854_v49 = vld [vmem:[%s2458_s1 + $0x288] sm:$0xff] }
  0x29   :  { %929 = vmatpush.bf16.msrb.mxu1 %v1819_v51  ;;  %v1846_v51 = vld [vmem:[%s2458_s1 + $0x248] sm:$0xff] }
  0x2a   :  { %916 = vmatpush.bf16.msrb.mxu0 %v1810_v52  ;;  %v1837_v52 = vld [vmem:[%s2458_s1 + $0x200] sm:$0xff] }
  0x2b   :  { %944 = vmatpush.bf16.msrb.mxu2 %v1826_v53  ;;  %v1853_v53 = vld [vmem:[%s2458_s1 + $0x280] sm:$0xff] }
  0x2c   :  { %958 = vmatpush.bf16.msrb.mxu3 %v1834_v54  ;;  %v1861_v54 = vld [vmem:[%s2458_s1 + $0x2c0] sm:$0xff] }
  0x2d   :  { %930 = vmatpush.bf16.msrb.mxu1 %v1818_v55  ;;  %v35_v55 = vld [vmem:[%s2460_s0 + $0x40] sm:$0xff] }
  0x2e   :  { %917 = vmatpush.bf16.msrb.mxu0 %v1809_v56  ;;  %v48_v56 = vld [vmem:[%s2460_s0 + $0xa8] sm:$0xff] }
  0x2f   :  { %945 = vmatpush.bf16.msrb.mxu2 %v1825_v57  ;;  %v37_v57 = vld [vmem:[%s2460_s0 + $0x50] sm:$0xff] }
  0x30   :  { %959 = vmatpush.bf16.msrb.mxu3 %v1833_v58  ;;  %v50_v58 = vld [vmem:[%s2460_s0 + $0xb8] sm:$0xff] }
  0x31   :  { %931 = vmatpush.bf16.msrb.mxu1 %v1817_v59  ;;  %v38_v59 = vld [vmem:[%s2460_s0 + $0x58] sm:$0xff] }
  0x32   :  { %918 = vmatpush.bf16.msrb.mxu0 %v1808_v60  ;;  %v51_v60 = vld [vmem:[%s2460_s0 + $0xc0] sm:$0xff] }
  0x33   :  { %946 = vmatpush.bf16.msrb.mxu2 %v1824_v61  ;;  %v1870_v61 = vld [vmem:[%s2458_s1 + $0x308] sm:$0xff] }
  0x34   :  { %960 = vmatpush.bf16.msrb.mxu3 %v1832_v62  ;;  %v1845_v62 = vld [vmem:[%s2458_s1 + $0x240] sm:$0xff] }
  0x35   :  { %932 = vmatpush.bf16.msrb.mxu1 %v1816_v63  ;;  %v61_v63 = vpack.c.bf16 %v48_v56, %v35_v55 }
  0x36   :  { %919 = vmatpush.bf16.msrb.mxu0 %v1807_v0  ;;  %v36_v0 = vld [vmem:[%s2460_s0 + $0x48] sm:$0xff] }
  0x37   :  { %947 = vmatpush.bf16.msrb.mxu2 %v1823_v1  ;;  %v49_v1 = vld [vmem:[%s2460_s0 + $0xb0] sm:$0xff] }
  0x38   :  { %961 = vmatpush.bf16.msrb.mxu3 %v1831_v2  ;;  %v63_v2 = vpack.c.bf16 %v50_v58, %v37_v57  ;;  %v1751_v57 = vld [vmem:[%s2463_s5 + $0x50] sm:$0xf]  ;;  %v1890_v58 = vld [vmem:[%s2463_s5 + $0x54] sm:$0xf0] }
  0x39   :  { %933 = vmatpush.bf16.msrb.mxu1 %v1815_v3  ;;  %v64_v3 = vpack.c.bf16 %v51_v60, %v38_v59 }
  0x3a   :  { %920 = vmatpush.bf16.msrb.mxu0 %v1806_v4  ;;  %v62_v4 = vpack.c.bf16 %v49_v1, %v36_v0  ;;  %v1752_v1 = vor.u32 %v1890_v58, %v1751_v57  ;;  %v1896_v58 = vld [vmem:[%s2461_s4] ss:$0 sm:$0xff] }
  0x3b   :  { %948 = vmatpush.bf16.msrb.mxu2 %v1822_v5  ;;  %v1869_v5 = vld [vmem:[%s2458_s1 + $0x300] sm:$0xff] }
  0x3c   :  { %962 = vmatpush.bf16.msrb.mxu3 %v1830_v6  ;;  %v39_v6 = vld [vmem:[%s2460_s0 + $0x60] sm:$0xff] }
  0x3d   :  { %934 = vmatpush.bf16.msrb.mxu1 %v1814_v7  ;;  %v52_v7 = vld [vmem:[%s2460_s0 + $0xc8] sm:$0xff] }
  0x3e   :  { %921 = vmatpush.bf16.msrb.mxu0 %v1805_v8  ;;  %v65_v8 = vpack.c.bf16 %v52_v7, %v39_v6  ;;  %v1888_v6 = vld [vmem:[%s2463_s5 + $0x44] sm:$0xf0] }
  0x3f   :  { %949 = vmatpush.bf16.msrb.mxu2 %v1821_v9 }
  0x40   :  { %963 = vmatpush.bf16.msrb.mxu3 %v1829_v10 }
  0x41   :  { %935 = vmatpush.bf16.msrb.mxu1 %v1813_v20  ;;  %922 = vmatmul.bf16.vlgmr.msrb.gmra.mxu0 %v57_v23  ;;  %v1875_v20 = vld [vmem:[%s2462_s3 + $0x20] sm:$0xff]  ;;  %v1874_v23 = vld [vmem:[%s2462_s3 + $0x18] sm:$0xff] }
  0x42   :  { %970 = vmatpush.bf16.msra.mxu0 %v1844_v11  ;;  %950 = vmatmul.bf16.vlgmr.msrb.gmra.mxu2 %v59_v24  ;;  %v1878_v11 = vld [vmem:[%s2462_s3 + $0x38] sm:$0xff] }
  0x43   :  { %998 = vmatpush.bf16.msra.mxu2 %v1860_v12  ;;  %964 = vmatmul.bf16.vlgmr.msrb.gmra.mxu3 %v60_v26 }
  0x44   :  { %1012 = vmatpush.bf16.msra.mxu3 %v1868_v17  ;;  %936 = vmatmul.bf16.vlgmr.msrb.gmra.mxu1 %v58_v27 }
  0x45   :  { %984 = vmatpush.bf16.msra.mxu1 %v1852_v25 }
  0x46   :  { %971 = vmatpush.bf16.msra.mxu0 %v1843_v28  ;;  %v1873_v28 = vld [vmem:[%s2462_s3 + $0x10] sm:$0xff] }
  0x47   :  { %999 = vmatpush.bf16.msra.mxu2 %v1859_v29 }
  0x48   :  { %1013 = vmatpush.bf16.msra.mxu3 %v1867_v30 }
  0x49   :  { %985 = vmatpush.bf16.msra.mxu1 %v1851_v31 }
  0x4a   :  { %972 = vmatpush.bf16.msra.mxu0 %v1842_v32  ;;  %v1872_v32 = vld [vmem:[%s2462_s3 + $0x8] sm:$0xff] }
  0x4b   :  { %1000 = vmatpush.bf16.msra.mxu2 %v1858_v33 }
  0x4c   :  { %1014 = vmatpush.bf16.msra.mxu3 %v1866_v34 }
  0x4d   :  { %986 = vmatpush.bf16.msra.mxu1 %v1850_v35 }
  0x4e   :  { %973 = vmatpush.bf16.msra.mxu0 %v1841_v36 }
  0x4f   :  { %1001 = vmatpush.bf16.msra.mxu2 %v1857_v37  ;;  %v1871_v37 = vld [vmem:[%s2462_s3] sm:$0xff] }
  0x50   :  { %1015 = vmatpush.bf16.msra.mxu3 %v1865_v38 }
  0x51   :  { %987 = vmatpush.bf16.msra.mxu1 %v1849_v39 }
  0x52   :  { %974 = vmatpush.bf16.msra.mxu0 %v1840_v40 }
  0x53   :  { %1002 = vmatpush.bf16.msra.mxu2 %v1856_v41 }
  0x54   :  { %1016 = vmatpush.bf16.msra.mxu3 %v1864_v42  ;;  %v1767_v42 = vld [vmem:[%s2463_s5 + $0x70] sm:$0xf] }
  0x55   :  { %988 = vmatpush.bf16.msra.mxu1 %v1848_v43  ;;  %v1894_v43 = vld [vmem:[%s2463_s5 + $0x74] sm:$0xf0] }
  0x56   :  { %975 = vmatpush.bf16.msra.mxu0 %v1839_v44  ;;  %v1893_v44 = vld [vmem:[%s2463_s5 + $0x74] sm:$0xf] }
  0x57   :  { %1003 = vmatpush.bf16.msra.mxu2 %v1855_v45 }
  0x58   :  { %1017 = vmatpush.bf16.msra.mxu3 %v1863_v46  ;;  %v1768_v46 = vor.u32 %v1894_v43, %v1767_v42  ;;  %v1729_v43 = vld [vmem:[%s2463_s5 + $0x28] sm:$0xf0] }
  0x59   :  { %989 = vmatpush.bf16.msra.mxu1 %v1847_v47  ;;  %v1769_v47 = vld [vmem:[%s2463_s5 + $0x78] sm:$0xf0] }
  0x5a   :  { %976 = vmatpush.bf16.msra.mxu0 %v1838_v48  ;;  %v1759_v48 = vld [vmem:[%s2463_s5 + $0x60] sm:$0xf] }
  0x5b   :  { %1004 = vmatpush.bf16.msra.mxu2 %v1854_v49  ;;  %v1892_v49 = vld [vmem:[%s2463_s5 + $0x64] sm:$0xf0] }
  0x5c   :  { %1018 = vmatpush.bf16.msra.mxu3 %v1862_v50  ;;  %v1760_v55 = vor.u32 %v1892_v49, %v1759_v48  ;;  %v1721_v49 = vld [vmem:[%s2463_s5 + $0x18] sm:$0xf0] }
  0x5d   :  { %990 = vmatpush.bf16.msra.mxu1 %v1846_v51 }
  0x5e   :  { %977 = vmatpush.bf16.msra.mxu0 %v1837_v52  ;;  %v1772_v52 = vor.u32 %v1893_v44, %v1769_v47  ;;  %v1881_v47 = vld [vmem:[%s2463_s5 + $0x14] sm:$0xf] }
  0x5f   :  { %1005 = vmatpush.bf16.msra.mxu2 %v1853_v53  ;;  %v1891_v53 = vld [vmem:[%s2463_s5 + $0x64] sm:$0xf] }
  0x60   :  { %1019 = vmatpush.bf16.msra.mxu3 %v1861_v54  ;;  %v1761_v54 = vld [vmem:[%s2463_s5 + $0x68] sm:$0xf0] }
  0x61   :  { %991 = vmatpush.bf16.msra.mxu1 %v1845_v62  ;;  %978 = vmatmul.bf16.vlgmr.msra.gmra.mxu0 %v61_v63  ;;  %v1764_v56 = vor.u32 %v1891_v53, %v1761_v54  ;;  %v1753_v62 = vld [vmem:[%s2463_s5 + $0x58] sm:$0xf0]  ;;  %v1879_v53 = vld [vmem:[%s2463_s5 + $0x4] sm:$0xf] }
  0x62   :  { %1032 = vmatpush.bf16.msrb.mxu0 %v1870_v61  ;;  %1006 = vmatmul.bf16.vlgmr.msra.gmra.mxu2 %v63_v2  ;;  %v1889_v61 = vld [vmem:[%s2463_s5 + $0x54] sm:$0xf] }
  0x63   :  { %1020 = vmatmul.bf16.vlgmr.msra.gmra.mxu3 %v64_v3  ;;  %1230 = vmatpush.bf16.msrb.mxu2 %v1768_v46  ;;  %v1882_v46 = vld [vmem:[%s2463_s5 + $0x14] sm:$0xf0] }
  0x64   :  { %992 = vmatmul.bf16.vlgmr.msra.gmra.mxu1 %v62_v4  ;;  %1244 = vmatpush.bf16.msrb.mxu3 %v1772_v52  ;;  %v1756_v4 = vor.u32 %v1889_v61, %v1753_v62  ;;  %v1880_v52 = vld [vmem:[%s2463_s5 + $0x4] sm:$0xf0] }
  0x65   :  { %1111 = vmatpush.bf16.msrb.mxu1 %v1878_v11 }
  0x66   :  { %1033 = vmatpush.bf16.msrb.mxu0 %v1869_v5  ;;  %v1743_v5 = vld [vmem:[%s2463_s5 + $0x40] sm:$0xf] }
  0x67   :  { %1231 = vmatpush.bf16.msrb.mxu2 %v1760_v55  ;;  %v1744_v11 = vor.u32 %v1888_v6, %v1743_v5  ;;  %v1713_v55 = vld [vmem:[%s2463_s5 + $0x8] sm:$0xf0] }
  0x68   :  { %1245 = vmatpush.bf16.msrb.mxu3 %v1764_v56  ;;  %v1716_v56 = vor.u32 %v1879_v53, %v1713_v55 }
  0x69   :  { %1112 = vmatpush.bf16.msrb.mxu1 %v1877_v13 }
  0x6b   :  { %1232 = vmatpush.bf16.msrb.mxu2 %v1752_v1  ;;  %v1144_v1 = vld [vmem:[%s2464_s6] sm:$0x3] }
  0x6c   :  { %1246 = vmatpush.bf16.msrb.mxu3 %v1756_v4 }
  0x6d   :  { %1113 = vmatpush.bf16.msrb.mxu1 %v1876_v16 }
  0x6f   :  { %1233 = vmatpush.bf16.msrb.mxu2 %v1744_v11 }
  0x71   :  { %1676 = vmatmul.msk.bf16.vlgmr.msrb.gmra.mxu0 %vm854_vm0, %v65_v8  ;;  %1114 = vmatpush.bf16.msrb.mxu1 %v1875_v20  ;;  %v1887_v8 = vld [vmem:[%s2463_s5 + $0x44] sm:$0xf] }
  0x75   :  { %1115 = vmatpush.bf16.msrb.mxu1 %v1874_v23 }
  0x79   :  { %1116 = vmatpush.bf16.msrb.mxu1 %v1873_v28 }
  0x7d   :  { %1117 = vmatpush.bf16.msrb.mxu1 %v1872_v32 }
  0x81   :  { %1118 = vmatpush.bf16.msrb.mxu1 %v1871_v37  ;;  %v1737_v37 = vld [vmem:[%s2463_s5 + $0x38] sm:$0xf0] }
  0x9e   :  { %v867_v9 = vpop.f32.mrf.mxu0 }
  0x9f   :  { %v868_v21 = vadd.f32 %v1895_v18, %v867_v9  ;;  %v1745_v9 = vld [vmem:[%s2463_s5 + $0x48] sm:$0xf0] }
  0xa1   :  { %v881_v10 = vpop.f32.mrf.mxu1 }
  0xa2   :  { %v882_v25 = vadd.f32 %v881_v10, %v868_v21 }
  0xa5   :  { %v895_v12 = vpop.f32.mrf.mxu2 }
  0xa6   :  { %v869_v14 = vpop.f32.mrf.mxu0  ;;  %v909_v15 = vpop.f32.mrf.mxu3  ;;  %v896_v29 = vadd.f32 %v895_v12, %v882_v25 }
  0xa7   :  { %v870_v27 = vadd.f32 %v1895_v18, %v869_v14  ;;  %v1748_v14 = vor.u32 %v1887_v8, %v1745_v9 }
  0xa8   :  { %v910_v34 = vadd.f32 %v909_v15, %v896_v29 }
  0xa9   :  { %v883_v17 = vpop.f32.mrf.mxu1  ;;  %1247 = vmatpush.bf16.msrb.mxu3 %v1748_v14 }
  0xaa   :  { %v884_v31 = vadd.f32 %v883_v17, %v870_v27 }
  0xad   :  { %v897_v19 = vpop.f32.mrf.mxu2 }
  0xae   :  { %v911_v24 = vpop.f32.mrf.mxu3  ;;  %v898_v36 = vadd.f32 %v897_v19, %v884_v31 }
  0xb0   :  { %v912_v40 = vadd.f32 %v911_v24, %v898_v36 }
  0xbe   :  { %v923_v22 = vpop.f32.mrf.mxu0 }
  0xbf   :  { %v924_v39 = vadd.f32 %v923_v22, %v910_v34  ;;  %v1886_v34 = vld [vmem:[%s2463_s5 + $0x34] sm:$0xf0] }
  0xc1   :  { %v937_v26 = vpop.f32.mrf.mxu1 }
  0xc2   :  { %v938_v50 = vadd.f32 %v937_v26, %v924_v39  ;;  %v1727_v39 = vld [vmem:[%s2463_s5 + $0x20] sm:$0xf] }
  0xc5   :  { %v951_v30 = vpop.f32.mrf.mxu2 }
  0xc6   :  { %v925_v33 = vpop.f32.mrf.mxu0  ;;  %v965_v35 = vpop.f32.mrf.mxu3  ;;  %v952_v63 = vadd.f32 %v951_v30, %v938_v50  ;;  %v1724_v50 = vor.u32 %v1881_v47, %v1721_v49 }
  0xc7   :  { %v926_v51 = vadd.f32 %v925_v33, %v912_v40  ;;  %v1735_v33 = vld [vmem:[%s2463_s5 + $0x30] sm:$0xf]  ;;  %v1884_v40 = vld [vmem:[%s2463_s5 + $0x24] sm:$0xf0] }
  0xc8   :  { %v966_v10 = vadd.f32 %v965_v35, %v952_v63  ;;  %v1885_v35 = vld [vmem:[%s2463_s5 + $0x34] sm:$0xf]  ;;  %v1736_v36 = vor.u32 %v1886_v34, %v1735_v33  ;;  %v1728_v42 = vor.u32 %v1884_v40, %v1727_v39 }
  0xc9   :  { %v939_v38 = vpop.f32.mrf.mxu1 }
  0xca   :  { %v940_v0 = vadd.f32 %v939_v38, %v926_v51  ;;  %v1740_v38 = vor.u32 %v1885_v35, %v1737_v37  ;;  %1234 = vmatpush.bf16.msrb.mxu2 %v1736_v36  ;;  %v1711_v51 = vld [vmem:[%s2463_s5] sm:$0xf] }
  0xcb   :  { %v1712_v54 = vor.u32 %v1880_v52, %v1711_v51 }
  0xcc   :  { %1248 = vmatpush.bf16.msrb.mxu3 %v1740_v38 }
  0xcd   :  { %v953_v41 = vpop.f32.mrf.mxu2 }
  0xce   :  { %v967_v59 = vpop.f32.mrf.mxu3  ;;  %v954_v2 = vadd.f32 %v953_v41, %v940_v0  ;;  %v1883_v41 = vld [vmem:[%s2463_s5 + $0x24] sm:$0xf]  ;;  %1235 = vmatpush.bf16.msrb.mxu2 %v1728_v42 }
  0xcf   :  { %v1732_v44 = vor.u32 %v1883_v41, %v1729_v43 }
  0xd0   :  { %v968_v12 = vadd.f32 %v967_v59, %v954_v2  ;;  %v1146_v2 = vperm.slane %v1144_v1, 0 }
  0xd1   :  { %1249 = vmatpush.bf16.msrb.mxu3 %v1732_v44 }
  0xd5   :  { %1250 = vmatpush.bf16.msrb.mxu3 %v1724_v50 }
  0xd9   :  { %1251 = vmatpush.bf16.msrb.mxu3 %v1716_v56 }
  0xde   :  { %v979_v45 = vpop.f32.mrf.mxu0 }
  0xdf   :  { %v980_v13 = vadd.f32 %v979_v45, %v966_v10  ;;  %v1719_v45 = vld [vmem:[%s2463_s5 + $0x10] sm:$0xf] }
  0xe0   :  { %v1720_v48 = vor.u32 %v1882_v46, %v1719_v45 }
  0xe1   :  { %v993_v60 = vpop.f32.mrf.mxu1 }
  0xe2   :  { %v994_v18 = vadd.f32 %v993_v60, %v980_v13  ;;  %1236 = vmatpush.bf16.msrb.mxu2 %v1720_v48 }
  0xe5   :  { %v1007_v3 = vpop.f32.mrf.mxu2 }
  0xe6   :  { %v981_v7 = vpop.f32.mrf.mxu0  ;;  %v1021_v15 = vpop.f32.mrf.mxu3  ;;  %v1008_v21 = vadd.f32 %v1007_v3, %v994_v18  ;;  %1237 = vmatpush.bf16.msrb.mxu2 %v1712_v54  ;;  %v1147_v3 = vperm.slane %v1144_v1, 1 }
  0xe7   :  { %v982_v16 = vadd.f32 %v981_v7, %v968_v12 }
  0xe8   :  { %v1022_v24 = vadd.f32 %v1021_v15, %v1008_v21 }
  0xe9   :  { %v995_v17 = vpop.f32.mrf.mxu1 }
  0xea   :  { %v996_v22 = vadd.f32 %v995_v17, %v982_v16 }
  0xed   :  { %v1009_v19 = vpop.f32.mrf.mxu2 }
  0xee   :  { %v1035_v20 = vpop.f32.mrf.mxu0  ;;  %v1010_v23 = vadd.f32 %v1009_v19, %v996_v22  ;;  %v1023_v25 = vpop.f32.mrf.mxu3 }
  0xef   :  { %v1036_v27 = vadd.f32 %v1035_v20, %v1022_v24 }
  0xf0   :  { %v1024_v26 = vadd.f32 %v1023_v25, %v1010_v23 }
  0xf1   :  { %v1040_v30 = vmax.f32 %v1036_v27, 0.0 }
  0xf6   :  { %v1037_v28 = vpop.f32.mrf.mxu0 }
  0xf7   :  { %v1038_v29 = vadd.f32 %v1037_v28, %v1024_v26 }
  0xf9   :  { %v1041_v31 = vmax.f32 %v1038_v29, 0.0 }
  0xfb   :  { %v1042_v32 = vpack.c.bf16 %v1041_v31, %v1040_v30 }
  0xfd   :  { %1119 = vmatmul.bf16.vlgmr.msrb.gmra.mxu1 %v1042_v32 }
 0x17a   :  { %v1120_v57 = vpop.f32.mrf.mxu1 }
 0x17b   :  { %v1121_v59 = vadd.f32 %v1896_v58, %v1120_v57 }
 0x17d   :  { %v1125_v62 = vmax.f32 %v1121_v59, 0.0 }
 0x182   :  { %v1122_v60 = vpop.f32.mrf.mxu1 }
 0x183   :  { %v1123_v61 = vadd.f32 %v1896_v58, %v1122_v60 }
 0x185   :  { %v1126_v63 = vmax.f32 %v1123_v61, 0.0 }
 0x187   :  { %v1127_v0 = vpack.c.bf16 %v1126_v63, %v1125_v62 }
 0x189   :  { %1238 = vmatmul.bf16.vlgmr.msrb.gmra.mxu2 %v1127_v0  ;;  %1252 = vmatmul.bf16.vlgmr.msrb.gmra.mxu3 %v1127_v0 }
 0x20c   :  { %v1239_v4 = vpop.f32.mrf.mxu2  ;;  %v1253_v5 = vpop.f32.mrf.mxu3 }
 0x20d   :  { %v1240_v6 = vadd.f32 %v1239_v4, %v1146_v2  ;;  %v1254_v7 = vadd.f32 %v1253_v5, %v1147_v3 }
 0x20f   :  { %1278 = vst [vmem:[%s2465_s7 + $0x8] sm:$0xff] %v1254_v7  ;;  %1258 = vmax.xlane.f32.xlu0 %v1240_v6 }
 0x214   :  { %v1241_v8 = vpop.f32.mrf.mxu2  ;;  %v1255_v9 = vpop.f32.mrf.mxu3 }
 0x215   :  { %v1242_v10 = vadd.f32 %v1241_v8, %v1146_v2  ;;  %v1256_v11 = vadd.f32 %v1255_v9, %v1147_v3 }
 0x217   :  { %1279 = vst [vmem:[%s2465_s7 + $0x18] sm:$0xff] %v1256_v11  ;;  %1260 = vmax.xlane.f32.xlu0 %v1242_v10 }
 0x282   :  { %v1259_v12 = vpop.xlane.xlu0 %1258 }
 0x283   :  { %v1262_v13 = vsub.f32 %v1240_v6, %v1259_v12 }
 0x285   :  { %v1264_v14 = vmul.f32 1.442695, %v1262_v13 }
 0x287   :  { %1897 = vpow2.f32 %v1264_v14 }
 0x28a   :  { %v1261_v15 = vpop.xlane.xlu0 %1260 }
 0x28b   :  { %v1263_v16 = vsub.f32 %v1242_v10, %v1261_v15 }
 0x28d   :  { %v1898_v17 = vpop.eup %1897  ;;  %v1266_v18 = vmul.f32 1.442695, %v1263_v16 }
 0x28e   :  { %1268 = vadd.xlane.f32.xlu1 %v1898_v17 }
 0x28f   :  { %1899 = vpow2.f32 %v1266_v18 }
 0x295   :  { %v1900_v19 = vpop.eup %1899 }
 0x296   :  { %1270 = vadd.xlane.f32.xlu1 %v1900_v19 }
 0x301   :  { %v1269_v20 = vpop.xlane.xlu1 %1268 }
 0x302   :  { %1901 = vrcp.f32 %v1269_v20 }
 0x308   :  { %v1902_v21 = vpop.eup %1901 }
 0x309   :  { %v1274_v22 = vmul.f32 %v1902_v21, %v1898_v17  ;;  %v1271_v23 = vpop.xlane.xlu1 %1270 }
 0x30a   :  { %1903 = vrcp.f32 %v1271_v23 }
 0x30b   :  { %1276 = vst [vmem:[%s2465_s7] sm:$0xff] %v1274_v22 }
 0x310   :  { %v1904_v24 = vpop.eup %1903 }
 0x311   :  { %v1275_v25 = vmul.f32 %v1904_v24, %v1900_v19 }
 0x313   :  { %1277 = vst [vmem:[%s2465_s7 + $0x10] sm:$0xff] %v1275_v25 }

</bundles_post_ra>
